<compile_context>
chip_gen: v7x
topology: tpu7x:2x2x1
jax: 0.10.0
libtpu: 0.0.40
codegen_flags: <defaults>
</compile_context>

<pallas_src>
import functools

import jax
import jax.numpy as jnp
from jax.experimental import pallas as pl
from jax.experimental.pallas import tpu as pltpu


def _round_up(v, m):
    return (v + m - 1) // m * m


def _pad2d(a, rows, cols):
    out = jnp.zeros((rows, cols), a.dtype)
    return out.at[:a.shape[0], :a.shape[1]].set(a)


def _gin_kernel(a_ref, xk_ref, xi_ref, w1_ref, b1_ref, w2_ref, b2_ref,
                bns_ref, bnb_ref, out_ref, acc_ref, *, one_plus_eps, residual):
    k = pl.program_id(1)

    @pl.when(k == 0)
    def _():
        acc_ref[...] = jnp.zeros_like(acc_ref)

    # Neighbour aggregation tile: (tile_n, tile_k) @ (tile_k, F) on the MXU.
    acc_ref[...] += jnp.dot(a_ref[...], xk_ref[...],
                            preferred_element_type=jnp.float32)

    @pl.when(k == pl.num_programs(1) - 1)
    def _():
        xi = xi_ref[...]
        h = acc_ref[...] + one_plus_eps * xi            # (1+eps)*x + sum_j x_j
        h = jnp.dot(h, w1_ref[...], preferred_element_type=jnp.float32)
        h = jnp.maximum(h + b1_ref[...], 0.0)           # Linear1 + ReLU
        h = jnp.dot(h, w2_ref[...], preferred_element_type=jnp.float32)
        h = h + b2_ref[...]                             # Linear2
        h = h * bns_ref[...] + bnb_ref[...]             # BatchNorm (eval affine)
        if residual:
            h = h + xi                                  # residual
        # TODO(synk): dropout is identity here (inference); training-mode dropout
        # would need pltpu.prng_seed / prng_random_bits in-kernel.
        out_ref[...] = h.astype(out_ref.dtype)


def gin_layer_forward(x, edge_index, w1, b1, w2, b2,
                      gamma, beta, running_mean, running_var,
                      *, eps=0.0, residual=True, batch_norm=True,
                      bn_eps=1e-5, tile_n=128, tile_k=128):
    """x: [N, in_features] f32; edge_index: [2, E] int32 (row0=src, row1=dst).

    Weights use PyTorch layouts: w1 [hidden, in], b1 [hidden], w2 [out, hidden],
    b2 [out]; BatchNorm params are per-feature [out].
    """
    N, f_in = x.shape
    hidden = w1.shape[0]
    f_out = w2.shape[0]
    if residual:
        assert f_in == f_out, "residual requires in_features == out_features"

    n_pad = _round_up(N, max(tile_n, tile_k))
    assert n_pad % tile_n == 0 and n_pad % tile_k == 0
    f_in_pad = _round_up(f_in, 128)
    h_pad = _round_up(hidden, 128)
    f_out_pad = _round_up(f_out, 128)

    # Dense adjacency A[dst, src] += 1 so the sparse scatter-add becomes an MXU
    # matmul inside the kernel (one-pass aggregation, no per-segment VPU scan).
    # TODO(synk): for very large sparse graphs replace dense A @ x with a
    # scalar-prefetched edge-list gather/scatter kernel.
    src = edge_index[0].astype(jnp.int32)
    dst = edge_index[1].astype(jnp.int32)
    a_pad = jnp.zeros((n_pad, n_pad), jnp.float32).at[dst, src].add(1.0)

    x_pad = _pad2d(x.astype(jnp.float32), n_pad, f_in_pad)
    w1_t = _pad2d(w1.T.astype(jnp.float32), f_in_pad, h_pad)
    w2_t = _pad2d(w2.T.astype(jnp.float32), h_pad, f_out_pad)
    b1_p = _pad2d(b1.reshape(1, -1).astype(jnp.float32), 1, h_pad)
    b2_p = _pad2d(b2.reshape(1, -1).astype(jnp.float32), 1, f_out_pad)

    # TODO(synk): BatchNorm1d implemented in eval mode (running stats folded to a
    # per-feature affine); training-mode batch statistics would need a cross-tile
    # reduction pass.
    if batch_norm:
        scale = gamma / jnp.sqrt(running_var + bn_eps)
        shift = beta - running_mean * scale
    else:
        scale = jnp.ones((f_out,), jnp.float32)
        shift = jnp.zeros((f_out,), jnp.float32)
    bns = _pad2d(scale.reshape(1, -1).astype(jnp.float32), 1, f_out_pad)
    bnb = _pad2d(shift.reshape(1, -1).astype(jnp.float32), 1, f_out_pad)

    kernel = functools.partial(_gin_kernel,
                               one_plus_eps=float(1.0 + eps),
                               residual=residual)

    out_pad = pl.pallas_call(
        kernel,
        out_shape=jax.ShapeDtypeStruct((n_pad, f_out_pad), x.dtype),
        grid_spec=pltpu.PrefetchScalarGridSpec(
            num_scalar_prefetch=0,
            grid=(n_pad // tile_n, n_pad // tile_k),
            in_specs=[
                pl.BlockSpec((tile_n, tile_k), lambda i, k: (i, k)),     # A tile
                pl.BlockSpec((tile_k, f_in_pad), lambda i, k: (k, 0)),   # x (contraction)
                pl.BlockSpec((tile_n, f_in_pad), lambda i, k: (i, 0)),   # x (row tile)
                pl.BlockSpec((f_in_pad, h_pad), lambda i, k: (0, 0)),    # W1^T
                pl.BlockSpec((1, h_pad), lambda i, k: (0, 0)),           # b1
                pl.BlockSpec((h_pad, f_out_pad), lambda i, k: (0, 0)),   # W2^T
                pl.BlockSpec((1, f_out_pad), lambda i, k: (0, 0)),       # b2
                pl.BlockSpec((1, f_out_pad), lambda i, k: (0, 0)),       # BN scale
                pl.BlockSpec((1, f_out_pad), lambda i, k: (0, 0)),       # BN shift
            ],
            out_specs=pl.BlockSpec((tile_n, f_out_pad), lambda i, k: (i, 0)),
            scratch_shapes=[pltpu.VMEM((tile_n, f_in_pad), jnp.float32)],
        ),
        compiler_params=pltpu.CompilerParams(
            dimension_semantics=("parallel", "arbitrary")),
    )(a_pad, x_pad, x_pad, w1_t, b1_p, w2_t, b2_p, bns, bnb)

    return out_pad[:N, :f_out]


def _reference(x, edge_index, w1, b1, w2, b2,
               gamma, beta, running_mean, running_var,
               *, eps=0.0, residual=True, batch_norm=True, bn_eps=1e-5):
    """Pure-JAX reference mirroring GINConv + MLP + BN(eval) + residual."""
    src, dst = edge_index[0], edge_index[1]
    agg = jnp.zeros_like(x).at[dst].add(x[src])
    h = (1.0 + eps) * x + agg
    h = jnp.maximum(h @ w1.T + b1, 0.0)
    h = h @ w2.T + b2
    if batch_norm:
        scale = gamma / jnp.sqrt(running_var + bn_eps)
        shift = beta - running_mean * scale
        h = h * scale + shift
    if residual:
        h = h + x
    return h


if __name__ == "__main__":
    key = jax.random.PRNGKey(0)
    (k_x, k_e1, k_e2, k_w1, k_b1, k_w2, k_b2,
     k_g, k_be, k_rm, k_rv) = jax.random.split(key, 11)

    N, E = 200, 512
    in_features = out_features = 32
    hidden = 32                      # mlp_hidden_dim defaults to in_features

    x = jax.random.normal(k_x, (N, in_features), dtype=jnp.float32)
    src = jax.random.randint(k_e1, (E,), 0, N, dtype=jnp.int32)
    dst = jax.random.randint(k_e2, (E,), 0, N, dtype=jnp.int32)
    edge_index = jnp.stack([src, dst])

    def linear_init(kw, kb, fan_out, fan_in):
        bound = 1.0 / (fan_in ** 0.5)
        w = jax.random.uniform(kw, (fan_out, fan_in), jnp.float32, -bound, bound)
        b = jax.random.uniform(kb, (fan_out,), jnp.float32, -bound, bound)
        return w, b

    w1, b1 = linear_init(k_w1, k_b1, hidden, in_features)
    w2, b2 = linear_init(k_w2, k_b2, out_features, hidden)

    gamma = jax.random.uniform(k_g, (out_features,), jnp.float32, 0.5, 1.5)
    beta = 0.1 * jax.random.normal(k_be, (out_features,), dtype=jnp.float32)
    running_mean = 0.1 * jax.random.normal(k_rm, (out_features,), dtype=jnp.float32)
    running_var = jax.random.uniform(k_rv, (out_features,), jnp.float32, 0.5, 1.5)

    out = gin_layer_forward(x, edge_index, w1, b1, w2, b2,
                            gamma, beta, running_mean, running_var,
                            eps=0.0, residual=True, batch_norm=True)
    out = jax.block_until_ready(out)

    with jax.default_matmul_precision("highest"):
        ref = _reference(x, edge_index, w1, b1, w2, b2,
                         gamma, beta, running_mean, running_var,
                         eps=0.0, residual=True, batch_norm=True)

    if out.shape == (N, out_features) and bool(
            jnp.allclose(out, ref, atol=2e-3, rtol=2e-3)):
        print("KERNEL_OK")
</pallas_src>

<mosaic_0001>
module attributes {stable_mosaic.version = 11 : i64} {
  func.func @_gin_kernel(%arg0: i32, %arg1: i32, %arg2: memref<128x128xf32, #tpu.memory_space<vmem>>, %arg3: memref<128x128xf32, #tpu.memory_space<vmem>>, %arg4: memref<128x128xf32, #tpu.memory_space<vmem>>, %arg5: memref<128x128xf32, #tpu.memory_space<vmem>>, %arg6: memref<1x128xf32, #tpu.memory_space<vmem>>, %arg7: memref<128x128xf32, #tpu.memory_space<vmem>>, %arg8: memref<1x128xf32, #tpu.memory_space<vmem>>, %arg9: memref<1x128xf32, #tpu.memory_space<vmem>>, %arg10: memref<1x128xf32, #tpu.memory_space<vmem>>, %arg11: memref<128x128xf32, #tpu.memory_space<vmem>>, %arg12: memref<128x128xf32, #tpu.memory_space<vmem>>) attributes {dimension_semantics = [#tpu.dimension_semantics<parallel>, #tpu.dimension_semantics<arbitrary>], iteration_bounds = array<i64: 2, 2>, scalar_prefetch = 0 : i64, scratch_operands = 1 : i64, tpu.core_type = #tpu.core_type<tc>, window_params = [{transform_indices = @transform_0, window_bounds = array<i64: 128, 128>}, {transform_indices = @transform_1, window_bounds = array<i64: 128, 128>}, {transform_indices = @transform_2, window_bounds = array<i64: 128, 128>}, {pipeline_mode = #tpu.pipeline_mode<synchronous>, transform_indices = @transform_3, window_bounds = array<i64: 128, 128>}, {pipeline_mode = #tpu.pipeline_mode<synchronous>, transform_indices = @transform_4, window_bounds = array<i64: 1, 128>}, {pipeline_mode = #tpu.pipeline_mode<synchronous>, transform_indices = @transform_5, window_bounds = array<i64: 128, 128>}, {pipeline_mode = #tpu.pipeline_mode<synchronous>, transform_indices = @transform_6, window_bounds = array<i64: 1, 128>}, {pipeline_mode = #tpu.pipeline_mode<synchronous>, transform_indices = @transform_7, window_bounds = array<i64: 1, 128>}, {pipeline_mode = #tpu.pipeline_mode<synchronous>, transform_indices = @transform_8, window_bounds = array<i64: 1, 128>}, {transform_indices = @transform_9, window_bounds = array<i64: 128, 128>}]} {
    %c0_i32 = arith.constant 0 : i32
    %0 = arith.cmpi eq, %arg1, %c0_i32 : i32
    %1 = arith.extui %0 : i1 to i32
    %c0_i32_0 = arith.constant 0 : i32
    %2 = arith.cmpi ne, %1, %c0_i32_0 : i32
    scf.if %2 {
      %cst_9 = arith.constant 0.000000e+00 : f32
      %12 = vector.broadcast %cst_9 : f32 to vector<128x128xf32>
      %c0_10 = arith.constant 0 : index
      %c0_11 = arith.constant 0 : index
      %13 = vector.load %arg12[%c0_10, %c0_11] : memref<128x128xf32, #tpu.memory_space<vmem>>, vector<128x128xf32>
      tpu.vector_store %arg12[%c0_10, %c0_11], %12 {strides = array<i32>} : memref<128x128xf32, #tpu.memory_space<vmem>>, vector<128x128xf32>,
    } else {
    }
    %c0 = arith.constant 0 : index
    %c0_1 = arith.constant 0 : index
    %3 = vector.load %arg12[%c0, %c0_1] : memref<128x128xf32, #tpu.memory_space<vmem>>, vector<128x128xf32>
    %c0_2 = arith.constant 0 : index
    %c0_3 = arith.constant 0 : index
    %4 = vector.load %arg2[%c0_2, %c0_3] : memref<128x128xf32, #tpu.memory_space<vmem>>, vector<128x128xf32>
    %c0_4 = arith.constant 0 : index
    %c0_5 = arith.constant 0 : index
    %5 = vector.load %arg3[%c0_4, %c0_5] : memref<128x128xf32, #tpu.memory_space<vmem>>, vector<128x128xf32>
    %cst = arith.constant dense<0.000000e+00> : vector<128x128xf32>
    %6 = tpu.matmul %4, %5, %cst {dimension_numbers = #tpu.dot_dimension_numbers<[1], [0], [0], [1], [0, 0, 1, 1], [], []>} : vector<128x128xf32>, vector<128x128xf32>, vector<128x128xf32> -> vector<128x128xf32>
    %7 = arith.addf %3, %6 : vector<128x128xf32>
    %c0_6 = arith.constant 0 : index
    %c0_7 = arith.constant 0 : index
    %8 = vector.load %arg12[%c0_6, %c0_7] : memref<128x128xf32, #tpu.memory_space<vmem>>, vector<128x128xf32>
    tpu.vector_store %arg12[%c0_6, %c0_7], %7 {strides = array<i32>} : memref<128x128xf32, #tpu.memory_space<vmem>>, vector<128x128xf32>,
    %c1_i32 = arith.constant 1 : i32
    %9 = arith.cmpi eq, %arg1, %c1_i32 : i32
    %10 = arith.extui %9 : i1 to i32
    %c0_i32_8 = arith.constant 0 : i32
    %11 = arith.cmpi ne, %10, %c0_i32_8 : i32
    scf.if %11 {
      %c0_9 = arith.constant 0 : index
      %c0_10 = arith.constant 0 : index
      %12 = vector.load %arg4[%c0_9, %c0_10] : memref<128x128xf32, #tpu.memory_space<vmem>>, vector<128x128xf32>
      %c0_11 = arith.constant 0 : index
      %c0_12 = arith.constant 0 : index
      %13 = vector.load %arg12[%c0_11, %c0_12] : memref<128x128xf32, #tpu.memory_space<vmem>>, vector<128x128xf32>
      %cst_13 = arith.constant 1.000000e+00 : f32
      %14 = vector.broadcast %cst_13 : f32 to vector<128x128xf32>
      %15 = arith.mulf %14, %12 : vector<128x128xf32>
      %16 = arith.addf %13, %15 : vector<128x128xf32>
      %c0_14 = arith.constant 0 : index
      %c0_15 = arith.constant 0 : index
      %17 = vector.load %arg5[%c0_14, %c0_15] : memref<128x128xf32, #tpu.memory_space<vmem>>, vector<128x128xf32>
      %cst_16 = arith.constant dense<0.000000e+00> : vector<128x128xf32>
      %18 = tpu.matmul %16, %17, %cst_16 {dimension_numbers = #tpu.dot_dimension_numbers<[1], [0], [0], [1], [0, 0, 1, 1], [], []>} : vector<128x128xf32>, vector<128x128xf32>, vector<128x128xf32> -> vector<128x128xf32>
      %c0_17 = arith.constant 0 : index
      %c0_18 = arith.constant 0 : index
      %19 = vector.load %arg6[%c0_17, %c0_18] : memref<1x128xf32, #tpu.memory_space<vmem>>, vector<1x128xf32>
      %20 = vector.broadcast %19 : vector<1x128xf32> to vector<128x128xf32>
      %21 = arith.addf %18, %20 : vector<128x128xf32>
      %cst_19 = arith.constant 0.000000e+00 : f32
      %22 = vector.broadcast %cst_19 : f32 to vector<128x128xf32>
      %23 = arith.maximumf %21, %22 : vector<128x128xf32>
      %c0_20 = arith.constant 0 : index
      %c0_21 = arith.constant 0 : index
      %24 = vector.load %arg7[%c0_20, %c0_21] : memref<128x128xf32, #tpu.memory_space<vmem>>, vector<128x128xf32>
      %cst_22 = arith.constant dense<0.000000e+00> : vector<128x128xf32>
      %25 = tpu.matmul %23, %24, %cst_22 {dimension_numbers = #tpu.dot_dimension_numbers<[1], [0], [0], [1], [0, 0, 1, 1], [], []>} : vector<128x128xf32>, vector<128x128xf32>, vector<128x128xf32> -> vector<128x128xf32>
      %c0_23 = arith.constant 0 : index
      %c0_24 = arith.constant 0 : index
      %26 = vector.load %arg8[%c0_23, %c0_24] : memref<1x128xf32, #tpu.memory_space<vmem>>, vector<1x128xf32>
      %27 = vector.broadcast %26 : vector<1x128xf32> to vector<128x128xf32>
      %28 = arith.addf %25, %27 : vector<128x128xf32>
      %c0_25 = arith.constant 0 : index
      %c0_26 = arith.constant 0 : index
      %29 = vector.load %arg9[%c0_25, %c0_26] : memref<1x128xf32, #tpu.memory_space<vmem>>, vector<1x128xf32>
      %30 = vector.broadcast %29 : vector<1x128xf32> to vector<128x128xf32>
      %31 = arith.mulf %28, %30 : vector<128x128xf32>
      %c0_27 = arith.constant 0 : index
      %c0_28 = arith.constant 0 : index
      %32 = vector.load %arg10[%c0_27, %c0_28] : memref<1x128xf32, #tpu.memory_space<vmem>>, vector<1x128xf32>
      %33 = vector.broadcast %32 : vector<1x128xf32> to vector<128x128xf32>
      %34 = arith.addf %31, %33 : vector<128x128xf32>
      %35 = arith.addf %34, %12 : vector<128x128xf32>
      %c0_29 = arith.constant 0 : index
      %c0_30 = arith.constant 0 : index
      %36 = vector.load %arg11[%c0_29, %c0_30] : memref<128x128xf32, #tpu.memory_space<vmem>>, vector<128x128xf32>
      tpu.vector_store %arg11[%c0_29, %c0_30], %35 {strides = array<i32>} : memref<128x128xf32, #tpu.memory_space<vmem>>, vector<128x128xf32>,
    } else {
    }
    return
  }
  func.func @transform_0(%arg0: i32, %arg1: i32) -> (i32, i32) {
    %c0_i32 = arith.constant 0 : i32
    return %arg0, %arg1 : i32, i32
  }
  func.func @transform_1(%arg0: i32, %arg1: i32) -> (i32, i32) {
    %c0_i32 = arith.constant 0 : i32
    %c0_i32_0 = arith.constant 0 : i32
    return %arg1, %c0_i32 : i32, i32
  }
  func.func @transform_2(%arg0: i32, %arg1: i32) -> (i32, i32) {
    %c0_i32 = arith.constant 0 : i32
    %c0_i32_0 = arith.constant 0 : i32
    return %arg0, %c0_i32 : i32, i32
  }
  func.func @transform_3(%arg0: i32, %arg1: i32) -> (i32, i32) {
    %c0_i32 = arith.constant 0 : i32
    %c0_i32_0 = arith.constant 0 : i32
    %c0_i32_1 = arith.constant 0 : i32
    return %c0_i32, %c0_i32_0 : i32, i32
  }
  func.func @transform_4(%arg0: i32, %arg1: i32) -> (i32, i32) {
    %c0_i32 = arith.constant 0 : i32
    %c0_i32_0 = arith.constant 0 : i32
    %c0_i32_1 = arith.constant 0 : i32
    return %c0_i32, %c0_i32_0 : i32, i32
  }
  func.func @transform_5(%arg0: i32, %arg1: i32) -> (i32, i32) {
    %c0_i32 = arith.constant 0 : i32
    %c0_i32_0 = arith.constant 0 : i32
    %c0_i32_1 = arith.constant 0 : i32
    return %c0_i32, %c0_i32_0 : i32, i32
  }
  func.func @transform_6(%arg0: i32, %arg1: i32) -> (i32, i32) {
    %c0_i32 = arith.constant 0 : i32
    %c0_i32_0 = arith.constant 0 : i32
    %c0_i32_1 = arith.constant 0 : i32
    return %c0_i32, %c0_i32_0 : i32, i32
  }
  func.func @transform_7(%arg0: i32, %arg1: i32) -> (i32, i32) {
    %c0_i32 = arith.constant 0 : i32
    %c0_i32_0 = arith.constant 0 : i32
    %c0_i32_1 = arith.constant 0 : i32
    return %c0_i32, %c0_i32_0 : i32, i32
  }
  func.func @transform_8(%arg0: i32, %arg1: i32) -> (i32, i32) {
    %c0_i32 = arith.constant 0 : i32
    %c0_i32_0 = arith.constant 0 : i32
    %c0_i32_1 = arith.constant 0 : i32
    return %c0_i32, %c0_i32_0 : i32, i32
  }
  func.func @transform_9(%arg0: i32, %arg1: i32) -> (i32, i32) {
    %c0_i32 = arith.constant 0 : i32
    %c0_i32_0 = arith.constant 0 : i32
    return %arg0, %c0_i32 : i32, i32
  }
}

</mosaic_0001>

<bundles_post_ra>
// kernel: tpu_custom_call.1
= control target key start
LH: loop header
LB: loop body
LE: loop exit
PB: predicated region body
PF: predicated region fallthrough
CT: control target
= control target key end

     0   :  { %s2999_s0 = inlined_call_operand.hbm [shape: f32[256,256], index: 0, kind: input, shape index: {}]   ;;  %s3000_s1 = inlined_call_operand.hbm [shape: f32[256,128], index: 1, kind: input, shape index: {}]   ;;  %s3001_s2 = inlined_call_operand.hbm [shape: f32[256,128], index: 2, kind: input, shape index: {}]   ;;  %s3002_s3 = inlined_call_operand.hbm [shape: f32[128,128], index: 3, kind: input, shape index: {}]   ;;  %s3003_s4 = inlined_call_operand.vmem [shape: f32[1,128], index: 4, kind: input, shape index: {}]   ;;  %s3004_s5 = inlined_call_operand.hbm [shape: f32[128,128], index: 5, kind: input, shape index: {}]   ;;  %s3005_s6 = inlined_call_operand.vmem [shape: f32[1,128], index: 6, kind: input, shape index: {}]   ;;  %s3006_s7 = inlined_call_operand.vmem [shape: f32[1,128], index: 7, kind: input, shape index: {}]   ;;  %s3007_s8 = inlined_call_operand.vmem [shape: f32[1,128], index: 8, kind: input, shape index: {}]   ;;  %s3008_s9 = inlined_call_operand.hbm [shape: f32[256,128], index: 9, kind: output, shape index: {}]  }
   0x1   :  { %3028 = sst [smem:[#allocation26_spill]] %s2999_s0 }
   0x2   :  { %3029 = sst [smem:[#allocation27_spill]] %s3000_s1 }
   0x3   :  { %3030 = sst [smem:[#allocation28_spill]] %s3002_s3 }
   0x4   :  { %3031 = sst [smem:[#allocation29_spill]] %s3003_s4 }
   0x5   :  { %3032 = sst [smem:[#allocation30_spill]] %s3005_s6 }
   0x6   :  { %3033 = sst [smem:[#allocation31_spill]] %s3006_s7 }
   0x7   :  { %3034 = sst [smem:[#allocation32_spill]] %s3007_s8 }
   0x8   :  { %3035 = sst [smem:[#allocation33_spill]] %s3008_s9 }
   0x9   :  { %14 = vsyncpa [#allocation4], 0 }
   0xa   :  { %16 = vsyncpa [#allocation4 + $0x1], 0 }
   0xb   :  { %17 = vsyncpa [#allocation7], 0 }
   0xc   :  { %19 = vsyncpa [#allocation7 + $0x1], 0 }
   0xd   :  { %20 = vsyncpa [#allocation10], 0 }
   0xe   :  { %21 = vsyncpa [#allocation5], 0 }
   0xf   :  { %23 = vsyncpa [#allocation5 + $0x1], 0  ;;  %s2311_s30 = smov 0   ;;  %s2313_s10 = smov 0  }
  0x10   :  { %s2315_s11 = smov 0   ;;  %s2317_s12 = smov 0  }
  0x11   :  { %s2319_s13 = smov 0   ;;  %s2321_s14 = smov 0  }
  0x12   :  { %s2323_s15 = smov 0   ;;  %s2325_s16 = smov 0  }
  0x13   :  { %s2327_s17 = smov 0   ;;  %s2329_s18 = smov 0  }
  0x14   :  { %s2331_s19 = smov 0   ;;  %s2333_s20 = smov 0  }
  0x15   :  { %s2335_s21 = smov 0   ;;  %s2337_s22 = smov 0  }
  0x16 LB: > { %3036 = sst [smem:[#allocation18_spill]] %s2211_s13  ;;  %s2382_s23 = sadd.s32 4294967295, %s2247_s22   ;;  %s2247_s22 = sphi %s2337_s22, %s29_s22   ;;  %s2243_s21 = sphi %s2335_s21, %s3109_s21   ;;  %s2239_s20 = sphi %s2333_s20, %s3108_s20   ;;  %s2235_s19 = sphi %s2331_s19, %s3107_s19   ;;  %s2231_s18 = sphi %s2329_s18, %s3106_s18   ;;  %s2227_s17 = sphi %s2327_s17, %s3105_s17   ;;  %s2223_s16 = sphi %s2325_s16, %s3104_s16   ;;  %s2219_s15 = sphi %s2323_s15, %s3103_s15   ;;  %s2215_s14 = sphi %s2321_s14, %s3102_s14   ;;  %s2211_s13 = sphi %s2319_s13, %s3094_s13   ;;  %s2207_s12 = sphi %s2317_s12, %s3101_s12   ;;  %s2203_s11 = sphi %s2315_s11, %s3100_s11   ;;  %s2199_s10 = sphi %s2313_s10, %s3099_s10   ;;  %s2195_s30 = sphi %s2311_s30, %s3098_s30  }
  0x17   : > { %3037 = sst [smem:[#allocation19_spill]] %s2215_s14  ;;  %p1368_p0 = scmp.ge.s32.totalorder %s2247_s22, 1 }
  0x18   : > { %3038 = sst [smem:[#allocation20_spill]] %s2231_s18  ;;  %p3010_p1 = scmp.eq.s32.totalorder %s2382_s23, 0 }
  0x19   : > { %3039 = sst [smem:[#allocation21_spill]] %s2235_s19  ;;  %p278_p3 = scmp.lt.s32.totalorder %s2247_s22, 5 }
  0x1a   : > { %s2249_s25 = smov [#allocation9]   ;;  %s3042_s3 = sld [smem:[#allocation28_spill]] }
  0x1b   : > { %p2388_p4 = pnand %p1368_p0, %p278_p3  ;;  %s290_s26 = sshll.u32 %s2249_s25, 4  ;;  %s291_s26 = int_to_ptr.vmem [resolvable:$true] %s290_s26 }
  0x1d   : > { %s3040_s24 = scalar_select %p2388_p4, 1, 0 }
  0x1e   : > { %p1796_p5 = pneg %p2388_p4 }
  0x20   : > { %p2396_p6 = pnand %p1796_p5, %p3010_p1  ;;  %s1943_s9 = scalar_lea.hbm %s3042_s3, 2048 }
  0x21   : > { %p1944_p7 = scmp.ne.s32.totalorder %s3042_s3, %s1943_s9  ;;  %p1950_p11 = scmp.lt.u32.totalorder %s1943_s9, %s3042_s3 }
  0x22   : > { %p3024_p8 = pneg %p2396_p6 }
  0x24   : > { %p1946_p9 = pnand %p3024_p8, %p1944_p7 }
  0x26   : > { %p1947_p10 = pneg %p1946_p9 }
  0x28   : > { %p1952_p12 = pnand %p1950_p11, %p1947_p10 }
  0x2a   : > { %1955 = shalt.err (!%p1952_p12)
}
  0x2b   : > { %s1956_s28 = scalar_lea.vmem %s291_s26, 2048  ;;  %p1964_p5 = scmp.lt.s32.totalorder %s291_s26, %s291_s26 }
  0x2c   : > { %p1957_p13 = scmp.ne.s32.totalorder %s291_s26, %s1956_s28  ;;  %p1965_p2 = scmp.lt.s32.totalorder %s1956_s28, %s1956_s28 }
  0x2e   : > { %p1959_p0 = pnand %p1957_p13, %p3024_p8  ;;  %p1966_p1 = por %p1965_p2, %p1964_p5 }
  0x30   : > { %p1960_p3 = pneg %p1959_p0 }
  0x32   : > { %p1967_p4 = pnand %p1966_p1, %p1960_p3 }
  0x34   : > { %1970 = shalt.err (!%p1967_p4)
}
  0x35   : > { %s3012_s8 = smov 128   ;;  %s3014_s7 = smov 8  }
  0x36   : > { %1799 = dma.hbm_to_vmem [thread:$0]  (!%p2396_p6), %s3042_s3, 2048, %s291_s26, [#allocation10], %s3012_s8, %s3012_s8, %s3014_s7  }
  0x37   : > { %s38_s29 = sadd.s32 1, %s2239_s20  ;;  %s41_s25 = sadd.s32 1, %s2243_s21 }
  0x38   : > { %p39_p1 = scmp.ge.s32.totalorder %s38_s29, 2  ;;  %p3023_p2 = scmp.eq.s32.totalorder %s2247_s22, 0 }
  0x39   : > { %s76_s28 = sadd.s32 1, %s2215_s14  ;;  %p83_p4 = scmp.ne.s32.totalorder %s2215_s14, %s2211_s13 }
  0x3a   : > { %s3111_s29 = smov (%p39_p1, %s38_s29), 0  ;;  %s3113_s25 = smov (!%p39_p1, %s41_s25), %s2243_s21 }
  0x3b   : > { %3043 = sst [smem:[#allocation22_spill]] %s3111_s29  ;;  %s46_s6 = ssub.s32 %s2239_s20, %s3111_s29 }
  0x3c   : > { %p2438_p7 = por %p83_p4, %p3023_p2  ;;  %p43_p9 = scmp.ge.s32.totalorder %s3113_s25, 2 }
  0x3d   : > { %p74_p10 = scmp.eq.s32.totalorder %s46_s6, 0  ;;  %p89_p11 = scmp.ne.s32.totalorder %s2211_s13, %s2207_s12 }
  0x3e   : > { %p3022_p12 = scmp.lt.s32.totalorder %s2247_s22, 4  ;;  %s3115_s25 = smov (%p43_p9, %s3113_s25), 0 }
  0x3f   : > { %3045 = sst [smem:[#allocation23_spill]] %s3115_s25  ;;  %s2452_s19 = ssub.s32 %s2243_s21, %s3115_s25 }
  0x40   : > { %s2448_s9 = scalar_select %p74_p10, %s2215_s14, %s76_s28  }
  0x41   : > { %p3047_p13 = scmp.eq.s32.totalorder %s2382_s23, 0  ;;  %s47_s7 = sor.u32 %s46_s6, %s2452_s19 }
  0x42   : > { %3046 = sst [smem:[#allocation24_spill]] %s2448_s9  ;;  %p2462_p5 = scmp.eq.s32.totalorder %s47_s7, 0 }
  0x43   : > { %p2456_p0 = por %p89_p11, %p3047_p13  ;;  %s352_s3 = sand.u32 1, %s2247_s22  }
  0x44   : > { %s3050_s12 = scalar_select %p2462_p5, 1, 0 }
  0x45   : > { %s3048_s8 = scalar_select %p2456_p0, 1, 0 }
  0x46   : > { %s354_s29 = sand.u32 1, %s2215_s14   ;;  %s1401_s28 = sshll.u32 %s2239_s20, 11 }
  0x47   : > { %3049 = sst [smem:[#allocation25_spill]] %s3048_s8  ;;  %s1376_s4 = sshll.u32 %s354_s29, 7 }
  0x48   : > { %s3051_s1 = sld [smem:[#allocation27_spill]]  ;;  %s356_s13 = scalar_lea.vmem [#allocation6], %s1376_s4 }
  0x49   : > { %s363_s6 = sshll.u32 %s356_s13, 4  ;;  %p2478_p1 = pnand %p3022_p12, %p2438_p7  ;;  %s2482_s6 = int_to_ptr.vmem [resolvable:$true] %s363_s6 }
  0x4a   : > { %s2252_s29 = smov [#allocation11]   ;;  %s2486_s9 = scalar_lea.sflag [#allocation7], %s352_s3 }
  0x4b   : > { %s2484_s25 = sshll.u32 %s2252_s29, 4  ;;  %p1973_p9 = pneg %p2478_p1  ;;  %s307_s25 = int_to_ptr.vmem [resolvable:$true] %s2484_s25 }
  0x4e   : > { %s2472_s18 = scalar_lea.hbm %s3051_s1, %s1401_s28  ;;  %s1976_s26 = scalar_lea.hbm %s3051_s1, 4096 }
  0x4f   : > { %s1971_s28 = scalar_lea.hbm %s2472_s18, 2048  ;;  %p1977_p11 = scmp.lt.u32.totalorder %s2472_s18, %s3051_s1 }
  0x50   : > { %p1972_p4 = scmp.ne.s32.totalorder %s2472_s18, %s1971_s28  ;;  %p1978_p13 = scmp.lt.u32.totalorder %s1976_s26, %s1971_s28 }
  0x51   : > { %p1980_p12 = scmp.lt.u32.totalorder %s1971_s28, %s2472_s18 }
  0x52   : > { %p1974_p10 = pnand %p1973_p9, %p1972_p4  ;;  %p1979_p3 = por %p1978_p13, %p1977_p11 }
  0x54   : > { %p1975_p7 = pneg %p1974_p10  ;;  %p1981_p2 = por %p1980_p12, %p1979_p3 }
  0x56   : > { %p1982_p8 = pnand %p1981_p2, %p1975_p7 }
  0x58   : > { %1985 = shalt.err (!%p1982_p8)
}
  0x59   : > { %s1986_s3 = scalar_lea.vmem %s2482_s6, 2048  ;;  %s2253_s29 = smov [#allocation6]  }
  0x5a   : > { %p1987_p4 = scmp.ne.s32.totalorder %s2482_s6, %s1986_s3  ;;  %s1991_s4 = sshll.u32 %s2253_s29, 4  ;;  %s1992_s4 = int_to_ptr.vmem [resolvable:$false] %s1991_s4 }
  0x5b   : > { %s1993_s14 = scalar_lea.vmem %s1992_s4, 4096  ;;  %p1994_p5 = scmp.lt.s32.totalorder %s2482_s6, %s1992_s4 }
  0x5c   : > { %p1989_p10 = pnand %p1987_p4, %p1973_p9  ;;  %p1995_p11 = scmp.lt.s32.totalorder %s1993_s14, %s1986_s3 }
  0x5e   : > { %p1990_p0 = pneg %p1989_p10  ;;  %p1996_p13 = por %p1995_p11, %p1994_p5 }
  0x60   : > { %p1997_p12 = pnand %p1996_p13, %p1990_p0 }
  0x62   : > { %2000 = shalt.err (!%p1997_p12)
}
  0x63   : > { %s3053_s8 = smov 8   ;;  %s3054_s28 = smov 128  }
  0x64   : > { %1809 = dma.hbm_to_vmem [thread:$0]  (!%p2478_p1), %s2472_s18, 2048, %s2482_s6, %s2486_s9, %s3054_s28, %s3054_s28, %s3053_s8  }
  0x65   : > { %s2001_s29 = scalar_lea.hbm %s3004_s5, 2048  ;;  %p3055_p2 = pneg %p2396_p6 }
  0x66   : > { %p2002_p8 = scmp.ne.s32.totalorder %s3004_s5, %s2001_s29  ;;  %p2008_p5 = scmp.lt.u32.totalorder %s2001_s29, %s3004_s5 }
  0x68   : > { %p2004_p0 = pnand %p2002_p8, %p3055_p2 }
  0x6a   : > { %p2005_p3 = pneg %p2004_p0 }
  0x6c   : > { %p2010_p9 = pnand %p2008_p5, %p2005_p3 }
  0x6e   : > { %2013 = shalt.err (!%p2010_p9)
}
  0x6f   : > { %s2014_s18 = scalar_lea.vmem %s307_s25, 2048  ;;  %p3056_p7 = pmov %p3055_p2 }
  0x70   : > { %p2015_p1 = scmp.ne.s32.totalorder %s307_s25, %s2014_s18  ;;  %p2022_p11 = scmp.lt.s32.totalorder %s307_s25, %s307_s25 }
  0x71   : > { %p2023_p13 = scmp.lt.s32.totalorder %s2014_s18, %s2014_s18 }
  0x72   : > { %p2017_p4 = pnand %p2015_p1, %p3056_p7 }
  0x73   : > { %p2024_p12 = por %p2023_p13, %p2022_p11 }
  0x74   : > { %p2018_p10 = pneg %p2017_p4 }
  0x76   : > { %p2025_p2 = pnand %p2024_p12, %p2018_p10 }
  0x78   : > { %2028 = shalt.err (!%p2025_p2)
}
  0x79   : > { %1802 = dma.hbm_to_vmem [thread:$0]  (!%p2396_p6), %s3004_s5, 2048, %s307_s25, [#allocation10], %s3054_s28, %s3054_s28, %s3053_s8  }
  0x7a   : > { %s50_s27 = sadd.s32 1, %s2227_s17  ;;  %p3057_p8 = scmp.ne.s32.totalorder %s3050_s12, 0 }
  0x7b   : > { %p57_p0 = scmp.ne.s32.totalorder %s2227_s17, %s2223_s16  ;;  %p63_p3 = scmp.ne.s32.totalorder %s2223_s16, %s2219_s15 }
  0x7c   : > { %s2545_s26 = scalar_select %p3057_p8, %s2227_s17, %s50_s27  }
  0x7d   : > { %s329_s29 = sand.u32 1, %s2227_s17   ;;  %s1400_s3 = sshll.u32 %s2243_s21, 5 }
  0x7e   : > { %p3058_p5 = scmp.eq.s32.totalorder %s2247_s22, 0  ;;  %p3059_p1 = scmp.eq.s32.totalorder %s2382_s23, 0 }
  0x7f   : > { %s1372_s7 = sshll.u32 %s329_s29, 7  ;;  %s339_s14 = sadd.s32 %s2239_s20, %s1400_s3 }
  0x80   : > { %p59_p9 = por %p3058_p5, %p57_p0  ;;  %p2557_p7 = por %p3059_p1, %p63_p3 }
  0x81   : > { %s1375_s18 = sshll.u32 %s339_s14, 7  ;;  %s333_s25 = scalar_lea.vmem [#allocation3], %s1372_s7 }
  0x82   : > { %s342_s6 = sshll.u32 %s333_s25, 4  ;;  %s3061_s0 = sld [smem:[#allocation26_spill]]  ;;  %s2567_s6 = int_to_ptr.vmem [resolvable:$true] %s342_s6 }
  0x83   : > { %p3062_p6 = scmp.lt.s32.totalorder %s2247_s22, 4  ;;  %s2575_s3 = scalar_lea.sflag [#allocation4], %s329_s29 }
  0x85   : > { %p2571_p4 = pnand %p3062_p6, %p59_p9 }
  0x87   : > { %p2031_p11 = pneg %p2571_p4 }
  0x88   : > { %s2565_s27 = scalar_lea.hbm %s3061_s0, %s1375_s18  ;;  %s2034_s25 = scalar_lea.hbm %s3061_s0, 8192 }
  0x89   : > { %s2029_s7 = scalar_lea.hbm %s2565_s27, 2048  ;;  %p2035_p2 = scmp.lt.u32.totalorder %s2565_s27, %s3061_s0 }
  0x8a   : > { %p2030_p10 = scmp.ne.s32.totalorder %s2565_s27, %s2029_s7  ;;  %p2036_p8 = scmp.lt.u32.totalorder %s2034_s25, %s2029_s7 }
  0x8b   : > { %p2038_p3 = scmp.lt.u32.totalorder %s2029_s7, %s2565_s27 }
  0x8c   : > { %p2032_p13 = pnand %p2031_p11, %p2030_p10  ;;  %p2037_p0 = por %p2036_p8, %p2035_p2 }
  0x8e   : > { %p2033_p12 = pneg %p2032_p13  ;;  %p2039_p5 = por %p2038_p3, %p2037_p0 }
  0x90   : > { %p2040_p9 = pnand %p2039_p5, %p2033_p12 }
  0x92   : > { %2043 = shalt.err (!%p2040_p9)
}
  0x93   : > { %s2044_s29 = scalar_lea.vmem %s2567_s6, 2048  ;;  %s2254_s14 = smov [#allocation3]  }
  0x94   : > { %p2045_p1 = scmp.ne.s32.totalorder %s2567_s6, %s2044_s29  ;;  %s2049_s18 = sshll.u32 %s2254_s14, 4  ;;  %s2050_s18 = int_to_ptr.vmem [resolvable:$false] %s2049_s18 }
  0x95   : > { %s2051_s13 = scalar_lea.vmem %s2050_s18, 4096  ;;  %p2052_p13 = scmp.lt.s32.totalorder %s2567_s6, %s2050_s18 }
  0x96   : > { %p2047_p6 = pnand %p2045_p1, %p2031_p11  ;;  %p2053_p2 = scmp.lt.s32.totalorder %s2051_s13, %s2044_s29 }
  0x98   : > { %p2048_p10 = pneg %p2047_p6  ;;  %p2054_p8 = por %p2053_p2, %p2052_p13 }
  0x9a   : > { %p2055_p0 = pnand %p2054_p8, %p2048_p10 }
  0x9c   : > { %2058 = shalt.err (!%p2055_p0)
}
  0x9d   : > { %s2255_s7 = smov 256   ;;  %s1367_s15 = sadd.s32 4294967294, %s2247_s22  }
  0x9e   : > { %1806 = dma.hbm_to_vmem [thread:$0]  (!%p2571_p4), %s2565_s27, 2048, %s2567_s6, %s2575_s3, %s2255_s7, %s3054_s28, %s3053_s8  }
  0x9f   : > { %s102_s25 = sadd.s32 1, %s2203_s11  ;;  %p109_p11 = scmp.ne.s32.totalorder %s2203_s11, %s2199_s10 }
  0xa0   : > { %p3064_p12 = scmp.eq.s32.totalorder %s2452_s19, 0  ;;  %p3065_p3 = scmp.eq.s32.totalorder %s2247_s22, 0 }
  0xa1   : > { %p115_p9 = scmp.ne.s32.totalorder %s2199_s10, %s2195_s30  ;;  %p3067_p1 = scmp.eq.s32.totalorder %s2382_s23, 3 }
  0xa2   : > { %s2612_s12 = scalar_select %p3064_p12, %s2203_s11, %s102_s25  }
  0xa3   : > { %p2616_p5 = por %p109_p11, %p3065_p3  ;;  %p2624_p6 = por %p3067_p1, %p109_p11 }
  0xa4   : > { %p271_p4 = scmp.eq.s32.totalorder %s1367_s15, 3  ;;  %p3069_p10 = scmp.eq.s32.totalorder %s2382_s23, 0 }
  0xa5   : > { %s3068_s14 = scalar_select %p2624_p6, 1, 0 }
  0xa6   : > { %p2630_p13 = por %p115_p9, %p3069_p10  ;;  %s375_s19 = sand.u32 1, %s2203_s11  }
  0xa7   : > { %p2635_p2 = por %p271_p4, %p115_p9  ;;  %s1379_s3 = sshll.u32 %s375_s19, 7 }
  0xa8   : > { %s3070_s6 = scalar_select %p2630_p13, 1, 0 }
  0xa9   : > { %s3071_s27 = scalar_select %p2635_p2, 1, 0 }
  0xaa   : > { %s1402_s18 = sshll.u32 %s2243_s21, 11  ;;  %s377_s15 = scalar_lea.vmem [#allocation8], %s1379_s3 }
  0xab   : > { %s2643_s25 = scalar_lea.hbm %s3001_s2, %s1402_s18  ;;  %s384_s0 = sshll.u32 %s377_s15, 4  ;;  %s2645_s0 = int_to_ptr.vmem [resolvable:$true] %s384_s0 }
  0xac   : > { %p3072_p8 = scmp.lt.s32.totalorder %s2247_s22, 4  ;;  %s2059_s19 = scalar_lea.hbm %s2643_s25, 2048 }
  0xad   : > { %p2060_p11 = scmp.ne.s32.totalorder %s2643_s25, %s2059_s19  ;;  %s2064_s13 = scalar_lea.hbm %s3001_s2, 4096 }
  0xae   : > { %p2651_p0 = pnand %p3072_p8, %p2616_p5  ;;  %p2065_p5 = scmp.lt.u32.totalorder %s2643_s25, %s3001_s2 }
  0xaf   : > { %p2066_p1 = scmp.lt.u32.totalorder %s2064_s13, %s2059_s19  ;;  %p2068_p10 = scmp.lt.u32.totalorder %s2059_s19, %s2643_s25 }
  0xb0   : > { %p2061_p12 = pneg %p2651_p0 }
  0xb1   : > { %p2067_p4 = por %p2066_p1, %p2065_p5 }
  0xb2   : > { %p2062_p3 = pnand %p2061_p12, %p2060_p11 }
  0xb3   : > { %p2069_p8 = por %p2068_p10, %p2067_p4 }
  0xb4   : > { %p2063_p9 = pneg %p2062_p3 }
  0xb6   : > { %p2070_p2 = pnand %p2069_p8, %p2063_p9 }
  0xb8   : > { %2073 = shalt.err (!%p2070_p2)
}
  0xb9   : > { %s2074_s15 = scalar_lea.vmem %s2645_s0, 2048  ;;  %s2256_s3 = smov [#allocation8]  }
  0xba   : > { %p2075_p11 = scmp.ne.s32.totalorder %s2645_s0, %s2074_s15  ;;  %s2079_s18 = sshll.u32 %s2256_s3, 4  ;;  %s2080_s18 = int_to_ptr.vmem [resolvable:$false] %s2079_s18 }
  0xbb   : > { %s2081_s29 = scalar_lea.vmem %s2080_s18, 4096  ;;  %p2082_p13 = scmp.lt.s32.totalorder %s2645_s0, %s2080_s18 }
  0xbc   : > { %p2077_p3 = pnand %p2075_p11, %p2061_p12  ;;  %p2083_p5 = scmp.lt.s32.totalorder %s2081_s29, %s2074_s15 }
  0xbe   : > { %p2078_p6 = pneg %p2077_p3  ;;  %p2084_p1 = por %p2083_p5, %p2082_p13 }
  0xc0   : > { %p2085_p4 = pnand %p2084_p1, %p2078_p6 }
  0xc2   : > { %2088 = shalt.err (!%p2085_p4)
}
  0xc3   : > { %1812 = dma.hbm_to_vmem [thread:$0]  (!%p2651_p0), %s2643_s25, 2048, %s2645_s0, %s2486_s9, %s3054_s28, %s3054_s28, %s3053_s8  }
  0xc4   : > { %p3074_p2 = scmp.ne.s32.totalorder %s3040_s24, 0 }
  0xc5   : > { %s398_s19 = sand.u32 (!%p3074_p2), 1, %s2223_s16  }
  0xc6   : > { %396 = sbr.rel (%p3074_p2) target bundleno = 1001 (0x3e9), region = 56  ;;  %s1383_s13 = sshll.u32 (!%p3074_p2), %s398_s19, 7 }
  0xc7   : > { %s399_s7 = scalar_lea.sflag (!%p3074_p2), [#allocation4], %s398_s19  ;;  %s2687_s15 = scalar_lea.vmem (!%p3074_p2), [#allocation3], %s1383_s13 }
  0xcd   : > { %2174 = dma.done.wait (%p2557_p7), %s399_s7, 2048  }
  0xce   : > { %2176 = vsyncadd (%p2557_p7), %s399_s7, 4294965248  ;;  %s3075_s1 = sld [smem:[#allocation18_spill]]  ;;  %s3076_s3 = sld [smem:[#allocation25_spill]] }
  0xcf   : > { %s407_s18 = sand.u32 1, %s2382_s23  }
  0xd0   : > { %s408_s24 = scalar_lea.sflag [#allocation7], %s407_s18 }
  0xd4   : > { %s409_s0 = sand.u32 1, %s3075_s1   ;;  %p3077_p6 = scmp.ne.s32.totalorder %s3076_s3, 0 }
  0xd5   : > { %s1384_s9 = sshll.u32 %s409_s0, 7 }
  0xd6   : > { %s2695_s8 = scalar_lea.vmem [#allocation6], %s1384_s9 }
  0xd7   : > { %2178 = dma.done.wait (%p3077_p6), %s408_s24, 2048  }
  0xd8   : > { %2180 = vsyncadd (%p3077_p6), %s408_s24, 4294965248  ;;  %s418_s28 = sand.u32 1, %s2199_s10   ;;  %p3078_p7 = scmp.ne.s32.totalorder %s3070_s6, 0 }
  0xd9   : > { %s1385_s4 = sshll.u32 %s418_s28, 7 }
  0xda   : > { %s2704_s25 = scalar_lea.vmem [#allocation8], %s1385_s4 }
  0xdb   : > { %2182 = dma.done.wait (%p3078_p7), %s408_s24, 2048  }
  0xdc   : > { %2184 = vsyncadd (%p3078_p7), %s408_s24, 4294965248  ;;  %p3079_p13 = scmp.eq.s32.totalorder %s2382_s23, 0 }
  0xde   : > { %2186 = dma.done.wait (%p3079_p13), [#allocation10], 4096   ;;  %p3080_p0 = pmov %p3079_p13 }
  0xdf   : > { %s2714_s29 = scalar_lea.vmem [#allocation12], %s1385_s4  ;;  %s3081_s19 = sld [smem:[#allocation20_spill]] }
  0xe0   : > { %2188 = vsyncadd (%p3080_p0), [#allocation10], 4294963200 }
  0xe5   : > { %p1389_p12 = scmp.ne.s32.totalorder %s3081_s19, 0 }
  0xe6   : > { %v2257_v0 = vmov (!%p1389_p12), 0.0  }
  0xe7   : > { %480 = sbr.rel (%p1389_p12) target bundleno = 239 (0xef), region = 80  ;;  %481 = vst [vmem:[#allocation2] sm:$0xff] (!%p1389_p12), %v2257_v0  ;;  %482 = vst [vmem:[#allocation2 + $0x8] sm:$0xff] (!%p1389_p12), %v2257_v0 }
  0xe8   : > { %483 = vst [vmem:[#allocation2 + $0x10] sm:$0xff] (!%p1389_p12), %v2257_v0  ;;  %484 = vst [vmem:[#allocation2 + $0x18] sm:$0xff] (!%p1389_p12), %v2257_v0 }
  0xe9   : > { %485 = vst [vmem:[#allocation2 + $0x20] sm:$0xff] (!%p1389_p12), %v2257_v0  ;;  %486 = vst [vmem:[#allocation2 + $0x28] sm:$0xff] (!%p1389_p12), %v2257_v0 }
  0xea   : > { %487 = vst [vmem:[#allocation2 + $0x30] sm:$0xff] (!%p1389_p12), %v2257_v0  ;;  %488 = vst [vmem:[#allocation2 + $0x38] sm:$0xff] (!%p1389_p12), %v2257_v0 }
  0xeb   : > { %489 = vst [vmem:[#allocation2 + $0x40] sm:$0xff] (!%p1389_p12), %v2257_v0  ;;  %490 = vst [vmem:[#allocation2 + $0x48] sm:$0xff] (!%p1389_p12), %v2257_v0 }
  0xec   : > { %491 = vst [vmem:[#allocation2 + $0x50] sm:$0xff] (!%p1389_p12), %v2257_v0  ;;  %492 = vst [vmem:[#allocation2 + $0x58] sm:$0xff] (!%p1389_p12), %v2257_v0 }
  0xed   : > { %493 = vst [vmem:[#allocation2 + $0x60] sm:$0xff] (!%p1389_p12), %v2257_v0  ;;  %494 = vst [vmem:[#allocation2 + $0x68] sm:$0xff] (!%p1389_p12), %v2257_v0 }
  0xee   : > { %495 = vst [vmem:[#allocation2 + $0x70] sm:$0xff] %v2257_v0  ;;  %496 = vst [vmem:[#allocation2 + $0x78] sm:$0xff] %v2257_v0 }
  0xef PF: > { %v529_v1 = vld [vmem:[%s2695_s8] sm:$0xff]  ;;  %v530_v2 = vld [vmem:[%s2695_s8 + $0x8] sm:$0xff]  ;;  %v531_v3 = vld [vmem:[%s2695_s8 + $0x10] sm:$0xff]  ;;  %s3082_s23 = sld [smem:[#allocation20_spill]] }
  0xf0   : > { %v1668_v4 = vpack.c.bf16 %v530_v2, %v529_v1  ;;  %v532_v5 = vld [vmem:[%s2695_s8 + $0x18] sm:$0xff]  ;;  %v533_v7 = vld [vmem:[%s2695_s8 + $0x20] sm:$0xff]  ;;  %v534_v8 = vld [vmem:[%s2695_s8 + $0x28] sm:$0xff] }
  0xf1   : > { %v1672_v6 = vpack.c.bf16 %v532_v5, %v531_v3  ;;  %v1676_v9 = vpack.c.bf16 %v534_v8, %v533_v7  ;;  %v513_v10 = vld [vmem:[%s2687_s15] sm:$0xff]  ;;  %v535_v12 = vld [vmem:[%s2695_s8 + $0x30] sm:$0xff]  ;;  %v536_v13 = vld [vmem:[%s2695_s8 + $0x38] sm:$0xff] }
  0xf2   : > { %1669 = vmatprep.subr.bf16.mxu0 %v1668_v4  ;;  %1764 = vmatprep.subr.bf16.mxu1 %v1668_v4  ;;  %v521_v11 = vld [vmem:[%s2687_s15 + $0x40] sm:$0xff]  ;;  %v1680_v14 = vpack.c.bf16 %v536_v13, %v535_v12  ;;  %v538_v16 = vld [vmem:[%s2695_s8 + $0x48] sm:$0xff]  ;;  %v539_v18 = vld [vmem:[%s2695_s8 + $0x50] sm:$0xff] }
  0xf3   : > { %1671 = vmatpush3.bf16.msra.mxu0 %v1668_v4  ;;  %1772 = vmatpush3.bf16.msra.mxu1 %v1668_v4  ;;  %v537_v15 = vld [vmem:[%s2695_s8 + $0x40] sm:$0xff]  ;;  %v540_v19 = vld [vmem:[%s2695_s8 + $0x58] sm:$0xff]  ;;  %v542_v22 = vld [vmem:[%s2695_s8 + $0x68] sm:$0xff] }
  0xf4   : > { %1673 = vmatprep.subr.bf16.mxu0 %v1672_v6  ;;  %1765 = vmatprep.subr.bf16.mxu1 %v1672_v6  ;;  %v1684_v17 = vpack.c.bf16 %v538_v16, %v537_v15  ;;  %v1688_v20 = vpack.c.bf16 %v540_v19, %v539_v18  ;;  %v541_v21 = vld [vmem:[%s2695_s8 + $0x60] sm:$0xff]  ;;  %v543_v24 = vld [vmem:[%s2695_s8 + $0x70] sm:$0xff]  ;;  %v544_v25 = vld [vmem:[%s2695_s8 + $0x78] sm:$0xff] }
  0xf5   : > { %1532 = vmatprep.mubr.f32.mxu0 %v513_v10  ;;  %1544 = vmatprep.mubr.f32.mxu1 %v521_v11  ;;  %v1692_v23 = vpack.c.bf16 %v542_v22, %v541_v21  ;;  %v1696_v26 = vpack.c.bf16 %v544_v25, %v543_v24  ;;  %v514_v27 = vld [vmem:[%s2687_s15 + $0x8] sm:$0xff]  ;;  %v515_v29 = vld [vmem:[%s2687_s15 + $0x10] sm:$0xff]  ;;  %v516_v31 = vld [vmem:[%s2687_s15 + $0x18] sm:$0xff]  ;;  %p1390_p9 = scmp.ne.s32.totalorder %s3082_s23, 1 }
  0xf6   : > { %v522_v28 = vld [vmem:[%s2687_s15 + $0x48] sm:$0xff]  ;;  %v523_v30 = vld [vmem:[%s2687_s15 + $0x50] sm:$0xff]  ;;  %v524_v32 = vld [vmem:[%s2687_s15 + $0x58] sm:$0xff]  ;;  %s3083_s7 = sld [smem:[#allocation29_spill]] (!%p1390_p9)  ;;  %s3084_s3 = sld [smem:[#allocation30_spill]] (!%p1390_p9) }
  0xf7   : > { %1675 = vmatpush3.bf16.msra.mxu0 %v1672_v6  ;;  %1773 = vmatpush3.bf16.msra.mxu1 %v1672_v6  ;;  %v517_v33 = vld [vmem:[%s2687_s15 + $0x20] sm:$0xff]  ;;  %v518_v35 = vld [vmem:[%s2687_s15 + $0x28] sm:$0xff]  ;;  %v519_v37 = vld [vmem:[%s2687_s15 + $0x30] sm:$0xff]  ;;  %s3085_s9 = sld [smem:[#allocation31_spill]] (!%p1390_p9)  ;;  %s3086_s4 = sld [smem:[#allocation32_spill]] (!%p1390_p9) }
  0xf8   : > { %1677 = vmatprep.subr.bf16.mxu0 %v1676_v9  ;;  %1766 = vmatprep.subr.bf16.mxu1 %v1676_v9  ;;  %v525_v34 = vld [vmem:[%s2687_s15 + $0x60] sm:$0xff]  ;;  %v526_v36 = vld [vmem:[%s2687_s15 + $0x68] sm:$0xff]  ;;  %v527_v38 = vld [vmem:[%s2687_s15 + $0x70] sm:$0xff] }
  0xf9   : > { %v520_v39 = vld [vmem:[%s2687_s15 + $0x38] sm:$0xff]  ;;  %v498_v41 = vld [vmem:[#allocation2 + $0x8] sm:$0xff]  ;;  %v497_v43 = vld [vmem:[#allocation2] sm:$0xff] }
  0xfa   : > { %v528_v40 = vld [vmem:[%s2687_s15 + $0x78] sm:$0xff]  ;;  %v506_v42 = vld [vmem:[#allocation2 + $0x48] sm:$0xff]  ;;  %v505_v44 = vld [vmem:[#allocation2 + $0x40] sm:$0xff] }
  0xfb   : > { %1679 = vmatpush3.bf16.msra.mxu0 %v1676_v9  ;;  %1774 = vmatpush3.bf16.msra.mxu1 %v1676_v9  ;;  %v500_v53 = vld [vmem:[#allocation2 + $0x18] sm:$0xff]  ;;  %v499_v55 = vld [vmem:[#allocation2 + $0x10] sm:$0xff]  ;;  %v502_v1 = vld [vmem:[#allocation2 + $0x28] sm:$0xff] }
  0xfc   : > { %1681 = vmatprep.subr.bf16.mxu0 %v1680_v14  ;;  %1767 = vmatprep.subr.bf16.mxu1 %v1680_v14  ;;  %v508_v54 = vld [vmem:[#allocation2 + $0x58] sm:$0xff]  ;;  %v507_v56 = vld [vmem:[#allocation2 + $0x50] sm:$0xff]  ;;  %v510_v2 = vld [vmem:[#allocation2 + $0x68] sm:$0xff] }
  0xfd   : > { %v501_v3 = vld [vmem:[#allocation2 + $0x20] sm:$0xff]  ;;  %v504_v13 = vld [vmem:[#allocation2 + $0x38] sm:$0xff]  ;;  %v503_v15 = vld [vmem:[#allocation2 + $0x30] sm:$0xff] }
  0xfe   : > { %v509_v4 = vld [vmem:[#allocation2 + $0x60] sm:$0xff]  ;;  %v511_v16 = vld [vmem:[#allocation2 + $0x70] sm:$0xff] }
  0xff   : > { %1683 = vmatpush3.bf16.msra.mxu0 %v1680_v14  ;;  %1775 = vmatpush3.bf16.msra.mxu1 %v1680_v14  ;;  %v512_v14 = vld [vmem:[#allocation2 + $0x78] sm:$0xff]  ;;  %v774_v25 = vld [vmem:[#allocation9] sm:$0xff] (!%p1390_p9) }
 0x100   : > { %1685 = vmatprep.subr.bf16.mxu0 %v1684_v17  ;;  %1768 = vmatprep.subr.bf16.mxu1 %v1684_v17 }
 0x103   : > { %1687 = vmatpush3.bf16.msra.mxu0 %v1684_v17  ;;  %1776 = vmatpush3.bf16.msra.mxu1 %v1684_v17 }
 0x104   : > { %1689 = vmatprep.subr.bf16.mxu0 %v1688_v20  ;;  %1769 = vmatprep.subr.bf16.mxu1 %v1688_v20 }
 0x107   : > { %1691 = vmatpush3.bf16.msra.mxu0 %v1688_v20  ;;  %1777 = vmatpush3.bf16.msra.mxu1 %v1688_v20 }
 0x108   : > { %1693 = vmatprep.subr.bf16.mxu0 %v1692_v23  ;;  %1770 = vmatprep.subr.bf16.mxu1 %v1692_v23 }
 0x10b   : > { %1695 = vmatpush3.bf16.msra.mxu0 %v1692_v23  ;;  %1778 = vmatpush3.bf16.msra.mxu1 %v1692_v23 }
 0x10c   : > { %1697 = vmatprep.subr.bf16.mxu0 %v1696_v26  ;;  %1771 = vmatprep.subr.bf16.mxu1 %v1696_v26 }
 0x10f   : > { %1699 = vmatpush3.bf16.msra.mxu0 %v1696_v26  ;;  %1779 = vmatpush3.bf16.msra.mxu1 %v1696_v26  ;;  %v775_v26 = vld [vmem:[#allocation9 + $0x8] sm:$0xff] (!%p1390_p9) }
 0x112   : > { %1533 = vmatmul.mubr.f32.vlgmr.msra.gmra.mrb[0].mxu0 %v514_v27  ;;  %1545 = vmatmul.mubr.f32.vlgmr.msra.gmra.mrb[0].mxu1 %v522_v28  ;;  %v776_v27 = vld [vmem:[#allocation9 + $0x10] sm:$0xff] (!%p1390_p9)  ;;  %v1700_v28 = vpack.c.bf16 (!%p1390_p9), %v775_v26, %v774_v25 }
 0x113   : > { %1535 = vmatprep.mubr.f32.mxu0 %v515_v29  ;;  %1547 = vmatprep.mubr.f32.mxu1 %v523_v30  ;;  %v777_v29 = vld [vmem:[#allocation9 + $0x18] sm:$0xff] (!%p1390_p9) }
 0x114   : > { %v1704_v30 = vpack.c.bf16 (!%p1390_p9), %v777_v29, %v776_v27  ;;  %1701 = vmatprep.subr.bf16.mxu0 (!%p1390_p9), %v1700_v28  ;;  %v2779_v27 = vld [vmem:[%s2704_s25 + $0x38] sm:$0xff] (!%p1390_p9)  ;;  %v2782_v29 = vld [vmem:[%s2704_s25 + $0x40] sm:$0xff] (!%p1390_p9) }
 0x115   : > { %1703 = vmatpush3.bf16.msra.mxu0 (!%p1390_p9), %v1700_v28 }
 0x116   : > { %1536 = vmatmul.mubr.f32.gmra.mrb[2].mxu0 %v516_v31  ;;  %1548 = vmatmul.mubr.f32.gmra.mrb[2].mxu1 %v524_v32  ;;  %v778_v31 = vld [vmem:[#allocation9 + $0x20] sm:$0xff] (!%p1390_p9)  ;;  %v779_v32 = vld [vmem:[#allocation9 + $0x28] sm:$0xff] (!%p1390_p9) }
 0x117   : > { %1538 = vmatprep.mubr.f32.mxu0 %v517_v33  ;;  %1550 = vmatprep.mubr.f32.mxu1 %v525_v34  ;;  %v1708_v33 = vpack.c.bf16 (!%p1390_p9), %v779_v32, %v778_v31  ;;  %v2751_v34 = vld [vmem:[%s2704_s25] sm:$0xff] (!%p1390_p9) }
 0x118   : > { %1705 = vmatprep.subr.bf16.mxu0 (!%p1390_p9), %v1704_v30 }
 0x119   : > { %1707 = vmatpush3.bf16.msra.mxu0 (!%p1390_p9), %v1704_v30 }
 0x11a   : > { %1539 = vmatmul.mubr.f32.gmra.mrb[4].mxu0 %v518_v35  ;;  %1551 = vmatmul.mubr.f32.gmra.mrb[4].mxu1 %v526_v36  ;;  %v780_v36 = vld [vmem:[#allocation9 + $0x30] sm:$0xff] (!%p1390_p9) }
 0x11b   : > { %1541 = vmatprep.mubr.f32.mxu0 %v519_v37  ;;  %1553 = vmatprep.mubr.f32.mxu1 %v527_v38  ;;  %v781_v37 = vld [vmem:[#allocation9 + $0x38] sm:$0xff] (!%p1390_p9) }
 0x11c   : > { %1709 = vmatprep.subr.bf16.mxu0 (!%p1390_p9), %v1708_v33 }
 0x11d   : > { %1711 = vmatpush3.bf16.msra.mxu0 (!%p1390_p9), %v1708_v33  ;;  %v2787_v33 = vld [vmem:[%s2704_s25 + $0x48] sm:$0xff] (!%p1390_p9) }
 0x11e   : > { %1542 = vmatmul.mubr.f32.gmra.mrb[6].mxu0 %v520_v39  ;;  %1554 = vmatmul.mubr.f32.gmra.mrb[6].mxu1 %v528_v40  ;;  %v1712_v39 = vpack.c.bf16 (!%p1390_p9), %v781_v37, %v780_v36  ;;  %v782_v40 = vld [vmem:[#allocation9 + $0x40] sm:$0xff] (!%p1390_p9)  ;;  %v2790_v36 = vld [vmem:[%s2704_s25 + $0x50] sm:$0xff] (!%p1390_p9) }
 0x120   : > { %1713 = vmatprep.subr.bf16.mxu0 (!%p1390_p9), %v1712_v39 }
 0x121   : > { %1715 = vmatpush3.bf16.msra.mxu0 (!%p1390_p9), %v1712_v39 }
 0x1e5   : > { %v1534_v45 = vpop.f32.mrb[0].mxu0  ;;  %v1546_v46 = vpop.f32.mrb[0].mxu1 }
 0x1e6   : > { %v691_v47 = vadd.f32 %v1534_v45, %v498_v41  ;;  %v699_v48 = vadd.f32 %v1546_v46, %v506_v42  ;;  %v611_v49 = vpop.f32.mrb[1].mxu0  ;;  %v651_v50 = vpop.f32.mrb[1].mxu1  ;;  %v783_v41 = vld [vmem:[#allocation9 + $0x48] sm:$0xff] (!%p1390_p9)  ;;  %v958_v45 = vld [vmem:[#allocation11] sm:$0xff] (!%p1390_p9) }
 0x1e7   : > { %v690_v51 = vadd.f32 %v611_v49, %v497_v43  ;;  %v698_v52 = vadd.f32 %v651_v50, %v505_v44  ;;  %v1716_v42 = vpack.c.bf16 (!%p1390_p9), %v783_v41, %v782_v40  ;;  %v784_v43 = vld [vmem:[#allocation9 + $0x50] sm:$0xff] (!%p1390_p9)  ;;  %v785_v44 = vld [vmem:[#allocation9 + $0x58] sm:$0xff] (!%p1390_p9)  ;;  %v959_v46 = vld [vmem:[#allocation11 + $0x8] sm:$0xff] (!%p1390_p9) }
 0x1e8   : > { %707 = vst [vmem:[#allocation2 + $0x8] sm:$0xff] %v691_v47  ;;  %715 = vst [vmem:[#allocation2 + $0x48] sm:$0xff] %v699_v48  ;;  %v960_v47 = vld [vmem:[#allocation11 + $0x10] sm:$0xff] (!%p1390_p9)  ;;  %v1720_v48 = vpack.c.bf16 (!%p1390_p9), %v785_v44, %v784_v43  ;;  %v786_v49 = vld [vmem:[#allocation9 + $0x60] sm:$0xff] (!%p1390_p9)  ;;  %v1732_v50 = vpack.c.bf16 (!%p1390_p9), %v959_v46, %v958_v45 }
 0x1e9   : > { %706 = vst [vmem:[#allocation2] sm:$0xff] %v690_v51  ;;  %714 = vst [vmem:[#allocation2 + $0x40] sm:$0xff] %v698_v52  ;;  %v1537_v57 = vpop.f32.mrb[2].mxu0  ;;  %v1549_v58 = vpop.f32.mrb[2].mxu1  ;;  %1717 = vmatprep.subr.bf16.mxu0 (!%p1390_p9), %v1716_v42  ;;  %v961_v51 = vld [vmem:[#allocation11 + $0x18] sm:$0xff] (!%p1390_p9)  ;;  %v787_v52 = vld [vmem:[#allocation9 + $0x68] sm:$0xff] (!%p1390_p9) }
 0x1ea   : > { %v693_v59 = vadd.f32 %v1537_v57, %v500_v53  ;;  %v701_v60 = vadd.f32 %v1549_v58, %v508_v54  ;;  %v621_v61 = vpop.f32.mrb[3].mxu0  ;;  %v661_v62 = vpop.f32.mrb[3].mxu1  ;;  %v1736_v53 = vpack.c.bf16 (!%p1390_p9), %v961_v51, %v960_v47  ;;  %v962_v54 = vld [vmem:[#allocation11 + $0x20] sm:$0xff] (!%p1390_p9)  ;;  %1733 = vmatprep.subr.bf16.mxu1 (!%p1390_p9), %v1732_v50  ;;  %1719 = vmatpush3.bf16.msra.mxu0 (!%p1390_p9), %v1716_v42  ;;  %v788_v57 = vld [vmem:[#allocation9 + $0x70] sm:$0xff] (!%p1390_p9)  ;;  %v2795_v40 = vld [vmem:[%s2704_s25 + $0x58] sm:$0xff] (!%p1390_p9) }
 0x1eb   : > { %v692_v63 = vadd.f32 %v621_v61, %v499_v55  ;;  %v700_v0 = vadd.f32 %v661_v62, %v507_v56  ;;  %v963_v55 = vld [vmem:[#allocation11 + $0x28] sm:$0xff] (!%p1390_p9)  ;;  %1735 = vmatpush3.bf16.msra.mxu1 (!%p1390_p9), %v1732_v50  ;;  %1721 = vmatprep.subr.bf16.mxu0 (!%p1390_p9), %v1720_v48  ;;  %v1724_v56 = vpack.c.bf16 (!%p1390_p9), %v787_v52, %v786_v49  ;;  %v965_v61 = vld [vmem:[#allocation11 + $0x38] sm:$0xff] (!%p1390_p9)  ;;  %v2798_v42 = vld [vmem:[%s2704_s25 + $0x60] sm:$0xff] (!%p1390_p9) }
 0x1ec   : > { %709 = vst [vmem:[#allocation2 + $0x18] sm:$0xff] %v693_v59  ;;  %717 = vst [vmem:[#allocation2 + $0x58] sm:$0xff] %v701_v60  ;;  %1737 = vmatprep.subr.bf16.mxu1 (!%p1390_p9), %v1736_v53  ;;  %v1740_v58 = vpack.c.bf16 (!%p1390_p9), %v963_v55, %v962_v54  ;;  %v789_v59 = vld [vmem:[#allocation9 + $0x78] sm:$0xff] (!%p1390_p9)  ;;  %v964_v60 = vld [vmem:[#allocation11 + $0x30] sm:$0xff] (!%p1390_p9) }
 0x1ed   : > { %708 = vst [vmem:[#allocation2 + $0x10] sm:$0xff] %v692_v63  ;;  %716 = vst [vmem:[#allocation2 + $0x50] sm:$0xff] %v700_v0  ;;  %v1540_v5 = vpop.f32.mrb[4].mxu0  ;;  %v1552_v6 = vpop.f32.mrb[4].mxu1  ;;  %v1728_v62 = vpack.c.bf16 (!%p1390_p9), %v789_v59, %v788_v57  ;;  %v1744_v63 = vpack.c.bf16 (!%p1390_p9), %v965_v61, %v964_v60  ;;  %v966_v0 = vld [vmem:[#allocation11 + $0x40] sm:$0xff] (!%p1390_p9)  ;;  %v2803_v46 = vld [vmem:[%s2704_s25 + $0x68] sm:$0xff] (!%p1390_p9) }
 0x1ee   : > { %v695_v7 = vadd.f32 %v1540_v5, %v502_v1  ;;  %v703_v8 = vadd.f32 %v1552_v6, %v510_v2  ;;  %v631_v9 = vpop.f32.mrb[5].mxu0  ;;  %v671_v10 = vpop.f32.mrb[5].mxu1  ;;  %1723 = vmatpush3.bf16.msra.mxu0 (!%p1390_p9), %v1720_v48  ;;  %v967_v1 = vld [vmem:[#allocation11 + $0x48] sm:$0xff] (!%p1390_p9)  ;;  %v2806_v48 = vld [vmem:[%s2704_s25 + $0x70] sm:$0xff] (!%p1390_p9)  ;;  %v2811_v52 = vld [vmem:[%s2704_s25 + $0x78] sm:$0xff] (!%p1390_p9) }
 0x1ef   : > { %v694_v11 = vadd.f32 %v631_v9, %v501_v3  ;;  %v702_v12 = vadd.f32 %v671_v10, %v509_v4  ;;  %725 = sbr.rel (%p1390_p9) target bundleno = 973 (0x3cd), region = 84  ;;  %1739 = vmatpush3.bf16.msra.mxu1 (!%p1390_p9), %v1736_v53  ;;  %1725 = vmatprep.subr.bf16.mxu0 (!%p1390_p9), %v1724_v56  ;;  %v2755_v2 = vld [vmem:[%s2704_s25 + $0x8] sm:$0xff] (!%p1390_p9)  ;;  %v2758_v4 = vld [vmem:[%s2704_s25 + $0x10] sm:$0xff] (!%p1390_p9)  ;;  %v1748_v6 = vpack.c.bf16 (!%p1390_p9), %v967_v1, %v966_v0 }
 0x1f0   : > { %711 = vst [vmem:[#allocation2 + $0x28] sm:$0xff] %v695_v7  ;;  %719 = vst [vmem:[#allocation2 + $0x68] sm:$0xff] %v703_v8  ;;  %v742_v35 = vld [vmem:[#allocation2] sm:$0xff] (!%p1390_p9)  ;;  %1741 = vmatprep.subr.bf16.mxu1 (!%p1390_p9), %v1740_v58  ;;  %v743_v3 = vld [vmem:[#allocation2 + $0x8] sm:$0xff] (!%p1390_p9) }
 0x1f1   : > { %710 = vst [vmem:[#allocation2 + $0x20] sm:$0xff] %v694_v11  ;;  %718 = vst [vmem:[#allocation2 + $0x60] sm:$0xff] %v702_v12  ;;  %v1543_v17 = vpop.f32.mrb[6].mxu0  ;;  %v1555_v18 = vpop.f32.mrb[6].mxu1  ;;  %v758_v38 = vadd.f32 (!%p1390_p9), %v742_v35, %v2751_v34  ;;  %v968_v7 = vld [vmem:[#allocation11 + $0x50] sm:$0xff] (!%p1390_p9)  ;;  %v969_v8 = vld [vmem:[#allocation11 + $0x58] sm:$0xff] (!%p1390_p9)  ;;  %v759_v9 = vadd.f32 (!%p1390_p9), %v743_v3, %v2755_v2 }
 0x1f2   : > { %v697_v19 = vadd.f32 %v1543_v17, %v504_v13  ;;  %v705_v20 = vadd.f32 %v1555_v18, %v512_v14  ;;  %v641_v21 = vpop.f32.mrb[7].mxu0  ;;  %v681_v22 = vpop.f32.mrb[7].mxu1  ;;  %1727 = vmatpush3.bf16.msra.mxu0 (!%p1390_p9), %v1724_v56  ;;  %v2763_v11 = vld [vmem:[%s2704_s25 + $0x18] sm:$0xff] (!%p1390_p9)  ;;  %v2766_v13 = vld [vmem:[%s2704_s25 + $0x20] sm:$0xff] (!%p1390_p9)  ;;  %v971_v17 = vld [vmem:[#allocation11 + $0x68] sm:$0xff] (!%p1390_p9) }
 0x1f3   : > { %v696_v23 = vadd.f32 %v641_v21, %v503_v15  ;;  %v704_v24 = vadd.f32 %v681_v22, %v511_v16  ;;  %1588 = vmatprep.mubr.f32.mxu0 (!%p1390_p9), %v758_v38  ;;  %1743 = vmatpush3.bf16.msra.mxu1 (!%p1390_p9), %v1740_v58  ;;  %v745_v12 = vld [vmem:[#allocation2 + $0x18] sm:$0xff] (!%p1390_p9)  ;;  %v1752_v15 = vpack.c.bf16 (!%p1390_p9), %v969_v8, %v968_v7  ;;  %v970_v16 = vld [vmem:[#allocation11 + $0x60] sm:$0xff] (!%p1390_p9)  ;;  %v2774_v22 = vld [vmem:[%s2704_s25 + $0x30] sm:$0xff] (!%p1390_p9) }
 0x1f4   : > { %713 = vst [vmem:[#allocation2 + $0x38] sm:$0xff] %v697_v19  ;;  %721 = vst [vmem:[#allocation2 + $0x78] sm:$0xff] %v705_v20  ;;  %1729 = vmatprep.subr.bf16.mxu0 (!%p1390_p9), %v1728_v62  ;;  %v744_v5 = vld [vmem:[#allocation2 + $0x10] sm:$0xff] (!%p1390_p9)  ;;  %1745 = vmatprep.subr.bf16.mxu1 (!%p1390_p9), %v1744_v63  ;;  %v761_v18 = vadd.f32 (!%p1390_p9), %v745_v12, %v2763_v11  ;;  %v2771_v20 = vld [vmem:[%s2704_s25 + $0x28] sm:$0xff] (!%p1390_p9) }
 0x1f5   : > { %712 = vst [vmem:[#allocation2 + $0x30] sm:$0xff] %v696_v23  ;;  %720 = vst [vmem:[#allocation2 + $0x70] sm:$0xff] %v704_v24  ;;  %v760_v10 = vadd.f32 (!%p1390_p9), %v744_v5, %v2758_v4  ;;  %v1756_v24 = vpack.c.bf16 (!%p1390_p9), %v971_v17, %v970_v16  ;;  %v750_v30 = vld [vmem:[#allocation2 + $0x40] sm:$0xff] (!%p1390_p9)  ;;  %v751_v35 = vld [vmem:[#allocation2 + $0x48] sm:$0xff] (!%p1390_p9) }
 0x1f6   : > { %1731 = vmatpush3.bf16.msra.mxu0 %v1728_v62  ;;  %v766_v32 = vadd.f32 %v750_v30, %v2782_v29  ;;  %v752_v37 = vld [vmem:[#allocation2 + $0x50] sm:$0xff]  ;;  %v767_v38 = vadd.f32 %v751_v35, %v2787_v33  ;;  %v753_v41 = vld [vmem:[#allocation2 + $0x58] sm:$0xff]  ;;  %v1391_v58 = vld [vmem:[%s3083_s7] ss:$0 sm:$0xff] }
 0x1f7   : > { %1747 = vmatpush3.bf16.msra.mxu1 %v1744_v63  ;;  %v747_v21 = vld [vmem:[#allocation2 + $0x28] sm:$0xff]  ;;  %v768_v39 = vadd.f32 %v752_v37, %v2790_v36  ;;  %v769_v44 = vadd.f32 %v753_v41, %v2795_v40  ;;  %v972_v55 = vld [vmem:[#allocation11 + $0x70] sm:$0xff]  ;;  %v973_v56 = vld [vmem:[#allocation11 + $0x78] sm:$0xff] }
 0x1f8   : > { %v746_v14 = vld [vmem:[#allocation2 + $0x20] sm:$0xff]  ;;  %1749 = vmatprep.subr.bf16.mxu1 %v1748_v6  ;;  %v763_v25 = vadd.f32 %v747_v21, %v2771_v20  ;;  %v755_v47 = vld [vmem:[#allocation2 + $0x68] sm:$0xff]  ;;  %v1760_v57 = vpack.c.bf16 %v973_v56, %v972_v55 }
 0x1f9   : > { %1589 = vmatmul.mubr.f32.vlgmr.msra.gmra.mrb[0].mxu0 %v759_v9  ;;  %v762_v19 = vadd.f32 %v746_v14, %v2766_v13  ;;  %v754_v43 = vld [vmem:[#allocation2 + $0x60] sm:$0xff]  ;;  %v771_v50 = vadd.f32 %v755_v47, %v2803_v46 }
 0x1fa   : > { %1591 = vmatprep.mubr.f32.mxu0 %v760_v10  ;;  %v770_v45 = vadd.f32 %v754_v43, %v2798_v42 }
 0x1fb   : > { %1751 = vmatpush3.bf16.msra.mxu1 %v1748_v6  ;;  %v749_v28 = vld [vmem:[#allocation2 + $0x38] sm:$0xff] }
 0x1fc   : > { %v748_v23 = vld [vmem:[#allocation2 + $0x30] sm:$0xff]  ;;  %1753 = vmatprep.subr.bf16.mxu1 %v1752_v15  ;;  %v765_v31 = vadd.f32 %v749_v28, %v2779_v27  ;;  %v757_v53 = vld [vmem:[#allocation2 + $0x78] sm:$0xff] }
 0x1fd   : > { %1592 = vmatmul.mubr.f32.gmra.mrb[2].mxu0 %v761_v18  ;;  %v764_v26 = vadd.f32 %v748_v23, %v2774_v22  ;;  %v756_v49 = vld [vmem:[#allocation2 + $0x70] sm:$0xff]  ;;  %v773_v54 = vadd.f32 %v757_v53, %v2811_v52 }
 0x1fe   : > { %1594 = vmatprep.mubr.f32.mxu0 %v762_v19  ;;  %v772_v51 = vadd.f32 %v756_v49, %v2806_v48 }
 0x1ff   : > { %1755 = vmatpush3.bf16.msra.mxu1 %v1752_v15 }
 0x200   : > { %1757 = vmatprep.subr.bf16.mxu1 %v1756_v24 }
 0x201   : > { %1595 = vmatmul.mubr.f32.gmra.mrb[4].mxu0 %v763_v25 }
 0x202   : > { %1597 = vmatprep.mubr.f32.mxu0 %v764_v26 }
 0x203   : > { %1759 = vmatpush3.bf16.msra.mxu1 %v1756_v24 }
 0x204   : > { %1761 = vmatprep.subr.bf16.mxu1 %v1760_v57 }
 0x205   : > { %1598 = vmatmul.mubr.f32.gmra.mrb[6].mxu0 %v765_v31 }
 0x206   : > { %1600 = vmatprep.mubr.f32.mxu0 %v766_v32 }
 0x207   : > { %1763 = vmatpush3.bf16.msra.mxu1 %v1760_v57 }
 0x209   : > { %1601 = vmatmul.mubr.f32.gmra.mrb[8].mxu0 %v767_v38 }
 0x20a   : > { %1603 = vmatprep.mubr.f32.mxu0 %v768_v39 }
 0x20d   : > { %1604 = vmatmul.mubr.f32.gmra.mrb[10].mxu0 %v769_v44 }
 0x20e   : > { %1606 = vmatprep.mubr.f32.mxu0 %v770_v45 }
 0x211   : > { %1607 = vmatmul.mubr.f32.gmra.mrb[12].mxu0 %v771_v50 }
 0x212   : > { %1609 = vmatprep.mubr.f32.mxu0 %v772_v51 }
 0x215   : > { %1610 = vmatmul.mubr.f32.gmra.mrb[14].mxu0 %v773_v54 }
 0x2cc   : > { %v1590_v59 = vpop.f32.mrb[0].mxu0 }
 0x2cd   : > { %v869_v60 = vadd.f32 %v1590_v59, %v1391_v58  ;;  %v863_v61 = vpop.f32.mrb[1].mxu0 }
 0x2ce   : > { %v864_v62 = vadd.f32 %v1391_v58, %v863_v61 }
 0x2cf   : > { %v943_v1 = vmax.f32 %v869_v60, 0.0  ;;  %v2820_v60 = vld [vmem:[%s3084_s3] ss:$0 sm:$0xff] }
 0x2d0   : > { %v1593_v63 = vpop.f32.mrb[2].mxu0  ;;  %v942_v0 = vmax.f32 %v864_v62, 0.0  ;;  %v2825_v62 = vld [vmem:[%s3085_s9] ss:$0 sm:$0xff] }
 0x2d1   : > { %v879_v3 = vadd.f32 %v1593_v63, %v1391_v58  ;;  %v873_v5 = vpop.f32.mrb[3].mxu0 }
 0x2d2   : > { %v874_v6 = vadd.f32 %v1391_v58, %v873_v5  ;;  %1644 = vmatprep.mubr.f32.mxu1 %v942_v0  ;;  %v2831_v0 = vld [vmem:[%s3086_s4] ss:$0 sm:$0xff] }
 0x2d3   : > { %1645 = vmatmul.mubr.f32.vlgmr.msra.gmra.mrb[0].mxu1 %v943_v1  ;;  %v945_v9 = vmax.f32 %v879_v3, 0.0 }
 0x2d4   : > { %v944_v7 = vmax.f32 %v874_v6, 0.0  ;;  %v1596_v8 = vpop.f32.mrb[4].mxu0 }
 0x2d5   : > { %v889_v10 = vadd.f32 %v1596_v8, %v1391_v58  ;;  %v883_v12 = vpop.f32.mrb[5].mxu0 }
 0x2d6   : > { %v884_v14 = vadd.f32 %v1391_v58, %v883_v12  ;;  %1647 = vmatprep.mubr.f32.mxu1 %v944_v7 }
 0x2d7   : > { %1648 = vmatmul.mubr.f32.gmra.mrb[2].mxu1 %v945_v9  ;;  %v947_v17 = vmax.f32 %v889_v10, 0.0 }
 0x2d8   : > { %v946_v15 = vmax.f32 %v884_v14, 0.0  ;;  %v1599_v16 = vpop.f32.mrb[6].mxu0 }
 0x2d9   : > { %v899_v18 = vadd.f32 %v1599_v16, %v1391_v58  ;;  %v893_v19 = vpop.f32.mrb[7].mxu0 }
 0x2da   : > { %v894_v21 = vadd.f32 %v1391_v58, %v893_v19  ;;  %1650 = vmatprep.mubr.f32.mxu1 %v946_v15 }
 0x2db   : > { %1651 = vmatmul.mubr.f32.gmra.mrb[4].mxu1 %v947_v17  ;;  %v949_v25 = vmax.f32 %v899_v18, 0.0 }
 0x2dc   : > { %v948_v23 = vmax.f32 %v894_v21, 0.0  ;;  %v1602_v24 = vpop.f32.mrb[8].mxu0 }
 0x2dd   : > { %v909_v26 = vadd.f32 %v1602_v24, %v1391_v58  ;;  %v903_v28 = vpop.f32.mrb[9].mxu0 }
 0x2de   : > { %v904_v30 = vadd.f32 %v1391_v58, %v903_v28  ;;  %1653 = vmatprep.mubr.f32.mxu1 %v948_v23 }
 0x2df   : > { %1654 = vmatmul.mubr.f32.gmra.mrb[6].mxu1 %v949_v25  ;;  %v951_v35 = vmax.f32 %v909_v26, 0.0 }
 0x2e0   : > { %v950_v31 = vmax.f32 %v904_v30, 0.0  ;;  %v1605_v32 = vpop.f32.mrb[10].mxu0 }
 0x2e1   : > { %v919_v37 = vadd.f32 %v1605_v32, %v1391_v58  ;;  %v913_v38 = vpop.f32.mrb[11].mxu0 }
 0x2e2   : > { %v914_v39 = vadd.f32 %v1391_v58, %v913_v38  ;;  %1656 = vmatprep.mubr.f32.mxu1 %v950_v31 }
 0x2e3   : > { %1657 = vmatmul.mubr.f32.gmra.mrb[8].mxu1 %v951_v35  ;;  %v953_v44 = vmax.f32 %v919_v37, 0.0 }
 0x2e4   : > { %v952_v41 = vmax.f32 %v914_v39, 0.0  ;;  %v1608_v43 = vpop.f32.mrb[12].mxu0 }
 0x2e5   : > { %v929_v45 = vadd.f32 %v1608_v43, %v1391_v58  ;;  %v923_v47 = vpop.f32.mrb[13].mxu0 }
 0x2e6   : > { %v924_v49 = vadd.f32 %v1391_v58, %v923_v47  ;;  %1659 = vmatprep.mubr.f32.mxu1 %v952_v41 }
 0x2e7   : > { %1660 = vmatmul.mubr.f32.gmra.mrb[10].mxu1 %v953_v44  ;;  %v955_v53 = vmax.f32 %v929_v45, 0.0 }
 0x2e8   : > { %v954_v50 = vmax.f32 %v924_v49, 0.0  ;;  %v1611_v51 = vpop.f32.mrb[14].mxu0 }
 0x2e9   : > { %v939_v54 = vadd.f32 %v1611_v51, %v1391_v58  ;;  %v933_v55 = vpop.f32.mrb[15].mxu0 }
 0x2ea   : > { %v934_v56 = vadd.f32 %v1391_v58, %v933_v55  ;;  %1662 = vmatprep.mubr.f32.mxu1 %v954_v50 }
 0x2eb   : > { %1663 = vmatmul.mubr.f32.gmra.mrb[12].mxu1 %v955_v53  ;;  %v957_v59 = vmax.f32 %v939_v54, 0.0 }
 0x2ec   : > { %v956_v57 = vmax.f32 %v934_v56, 0.0 }
 0x2ee   : > { %1665 = vmatprep.mubr.f32.mxu1 %v956_v57 }
 0x2ef   : > { %1666 = vmatmul.mubr.f32.gmra.mrb[14].mxu1 %v957_v59 }
 0x3a6   : > { %v1646_v61 = vpop.f32.mrb[0].mxu1 }
 0x3a7   : > { %v1053_v63 = vadd.f32 %v1646_v61, %v2820_v60  ;;  %v1047_v58 = vpop.f32.mrb[1].mxu1 }
 0x3a8   : > { %v1048_v1 = vadd.f32 %v2820_v60, %v1047_v58 }
 0x3a9   : > { %v1134_v3 = vmul.f32 %v2825_v62, %v1053_v63 }
 0x3aa   : > { %v1133_v5 = vmul.f32 %v2825_v62, %v1048_v1  ;;  %v1649_v6 = vpop.f32.mrb[2].mxu1 }
 0x3ab   : > { %v1157_v7 = vadd.f32 %v2831_v0, %v1134_v3  ;;  %v1063_v8 = vadd.f32 %v1649_v6, %v2820_v60  ;;  %v1057_v9 = vpop.f32.mrb[3].mxu1 }
 0x3ac   : > { %v1156_v10 = vadd.f32 %v2831_v0, %v1133_v5  ;;  %v1058_v12 = vadd.f32 %v2820_v60, %v1057_v9 }
 0x3ad   : > { %v1173_v14 = vadd.f32 %v1157_v7, %v2755_v2  ;;  %v1136_v15 = vmul.f32 %v2825_v62, %v1063_v8 }
 0x3ae   : > { %v1172_v16 = vadd.f32 %v1156_v10, %v2751_v34  ;;  %v1135_v17 = vmul.f32 %v2825_v62, %v1058_v12  ;;  %v1652_v18 = vpop.f32.mrb[4].mxu1 }
 0x3af   : > { %1189 = vst [vmem:[%s2714_s29 + $0x8] sm:$0xff] %v1173_v14  ;;  %v1159_v19 = vadd.f32 %v2831_v0, %v1136_v15  ;;  %v1073_v21 = vadd.f32 %v1652_v18, %v2820_v60  ;;  %v1067_v23 = vpop.f32.mrb[5].mxu1 }
 0x3b0   : > { %1188 = vst [vmem:[%s2714_s29] sm:$0xff] %v1172_v16  ;;  %v1158_v24 = vadd.f32 %v2831_v0, %v1135_v17  ;;  %v1068_v2 = vadd.f32 %v2820_v60, %v1067_v23 }
 0x3b1   : > { %v1175_v25 = vadd.f32 %v1159_v19, %v2763_v11  ;;  %v1138_v26 = vmul.f32 %v2825_v62, %v1073_v21 }
 0x3b2   : > { %v1174_v34 = vadd.f32 %v1158_v24, %v2758_v4  ;;  %v1137_v28 = vmul.f32 %v2825_v62, %v1068_v2  ;;  %v1655_v30 = vpop.f32.mrb[6].mxu1 }
 0x3b3   : > { %1191 = vst [vmem:[%s2714_s29 + $0x18] sm:$0xff] %v1175_v25  ;;  %v1161_v31 = vadd.f32 %v2831_v0, %v1138_v26  ;;  %v1083_v32 = vadd.f32 %v1655_v30, %v2820_v60  ;;  %v1077_v35 = vpop.f32.mrb[7].mxu1 }
 0x3b4   : > { %1190 = vst [vmem:[%s2714_s29 + $0x10] sm:$0xff] %v1174_v34  ;;  %v1160_v37 = vadd.f32 %v2831_v0, %v1137_v28  ;;  %v1078_v11 = vadd.f32 %v2820_v60, %v1077_v35 }
 0x3b5   : > { %v1177_v38 = vadd.f32 %v1161_v31, %v2771_v20  ;;  %v1140_v39 = vmul.f32 %v2825_v62, %v1083_v32 }
 0x3b6   : > { %v1176_v4 = vadd.f32 %v1160_v37, %v2766_v13  ;;  %v1139_v41 = vmul.f32 %v2825_v62, %v1078_v11  ;;  %v1658_v43 = vpop.f32.mrb[8].mxu1 }
 0x3b7   : > { %1193 = vst [vmem:[%s2714_s29 + $0x28] sm:$0xff] %v1177_v38  ;;  %v1163_v44 = vadd.f32 %v2831_v0, %v1140_v39  ;;  %v1093_v45 = vadd.f32 %v1658_v43, %v2820_v60  ;;  %v1087_v47 = vpop.f32.mrb[9].mxu1 }
 0x3b8   : > { %1192 = vst [vmem:[%s2714_s29 + $0x20] sm:$0xff] %v1176_v4  ;;  %v1162_v49 = vadd.f32 %v2831_v0, %v1139_v41  ;;  %v1088_v20 = vadd.f32 %v2820_v60, %v1087_v47 }
 0x3b9   : > { %v1179_v50 = vadd.f32 %v1163_v44, %v2779_v27  ;;  %v1142_v51 = vmul.f32 %v2825_v62, %v1093_v45 }
 0x3ba   : > { %v1178_v13 = vadd.f32 %v1162_v49, %v2774_v22  ;;  %v1141_v53 = vmul.f32 %v2825_v62, %v1088_v20  ;;  %v1661_v54 = vpop.f32.mrb[10].mxu1 }
 0x3bb   : > { %1195 = vst [vmem:[%s2714_s29 + $0x38] sm:$0xff] %v1179_v50  ;;  %v1165_v55 = vadd.f32 %v2831_v0, %v1142_v51  ;;  %v1103_v56 = vadd.f32 %v1661_v54, %v2820_v60  ;;  %v1097_v57 = vpop.f32.mrb[11].mxu1 }
 0x3bc   : > { %1194 = vst [vmem:[%s2714_s29 + $0x30] sm:$0xff] %v1178_v13  ;;  %v1164_v59 = vadd.f32 %v2831_v0, %v1141_v53  ;;  %v1098_v27 = vadd.f32 %v2820_v60, %v1097_v57 }
 0x3bd   : > { %v1181_v61 = vadd.f32 %v1165_v55, %v2787_v33  ;;  %v1144_v63 = vmul.f32 %v2825_v62, %v1103_v56 }
 0x3be   : > { %v1180_v22 = vadd.f32 %v1164_v59, %v2782_v29  ;;  %v1143_v58 = vmul.f32 %v2825_v62, %v1098_v27  ;;  %v1664_v1 = vpop.f32.mrb[12].mxu1 }
 0x3bf   : > { %1197 = vst [vmem:[%s2714_s29 + $0x48] sm:$0xff] %v1181_v61  ;;  %v1167_v3 = vadd.f32 %v2831_v0, %v1144_v63  ;;  %v1113_v5 = vadd.f32 %v1664_v1, %v2820_v60  ;;  %v1107_v6 = vpop.f32.mrb[13].mxu1 }
 0x3c0   : > { %1196 = vst [vmem:[%s2714_s29 + $0x40] sm:$0xff] %v1180_v22  ;;  %v1166_v7 = vadd.f32 %v2831_v0, %v1143_v58  ;;  %v1108_v33 = vadd.f32 %v2820_v60, %v1107_v6 }
 0x3c1   : > { %v1183_v8 = vadd.f32 %v1167_v3, %v2795_v40  ;;  %v1146_v29 = vmul.f32 %v2825_v62, %v1113_v5 }
 0x3c2   : > { %v1182_v9 = vadd.f32 %v1166_v7, %v2790_v36  ;;  %v1145_v10 = vmul.f32 %v2825_v62, %v1108_v33  ;;  %v1667_v12 = vpop.f32.mrb[14].mxu1 }
 0x3c3   : > { %1199 = vst [vmem:[%s2714_s29 + $0x58] sm:$0xff] %v1183_v8  ;;  %v1169_v14 = vadd.f32 %v2831_v0, %v1146_v29  ;;  %v1123_v15 = vadd.f32 %v1667_v12, %v2820_v60  ;;  %v1117_v16 = vpop.f32.mrb[15].mxu1 }
 0x3c4   : > { %1198 = vst [vmem:[%s2714_s29 + $0x50] sm:$0xff] %v1182_v9  ;;  %v1168_v40 = vadd.f32 %v2831_v0, %v1145_v10  ;;  %v1118_v17 = vadd.f32 %v2820_v60, %v1117_v16 }
 0x3c5   : > { %v1185_v18 = vadd.f32 %v1169_v14, %v2803_v46  ;;  %v1148_v36 = vmul.f32 %v2825_v62, %v1123_v15 }
 0x3c6   : > { %v1184_v19 = vadd.f32 %v1168_v40, %v2798_v42  ;;  %v1147_v21 = vmul.f32 %v2825_v62, %v1118_v17 }
 0x3c7   : > { %1201 = vst [vmem:[%s2714_s29 + $0x68] sm:$0xff] %v1185_v18  ;;  %v1171_v23 = vadd.f32 %v2831_v0, %v1148_v36 }
 0x3c8   : > { %1200 = vst [vmem:[%s2714_s29 + $0x60] sm:$0xff] %v1184_v19  ;;  %v1170_v24 = vadd.f32 %v2831_v0, %v1147_v21 }
 0x3c9   : > { %v1187_v2 = vadd.f32 %v1171_v23, %v2811_v52 }
 0x3ca   : > { %v1186_v25 = vadd.f32 %v1170_v24, %v2806_v48 }
 0x3cb   : > { %1203 = vst [vmem:[%s2714_s29 + $0x78] sm:$0xff] %v1187_v2 }
 0x3cc   : > { %1202 = vst [vmem:[%s2714_s29 + $0x70] sm:$0xff] %v1186_v25 }
 0x3cd PF: > { %s3087_s25 = sld [smem:[#allocation21_spill]]  ;;  %s3088_s13 = sld [smem:[#allocation33_spill]] }
 0x3ce   : > { %s1218_s1 = sshll.u32 %s2714_s29, 4  ;;  %s2923_s3 = scalar_lea.sflag [#allocation5], %s418_s28  ;;  %s2919_s1 = int_to_ptr.vmem [resolvable:$true] %s1218_s1 }
 0x3cf   : > { %s2089_s18 = scalar_lea.vmem %s2919_s1, 2048  ;;  %p3090_p8 = scmp.ne.s32.totalorder %s3068_s14, 0 }
 0x3d0   : > { %p2090_p10 = scmp.ne.s32.totalorder %s2919_s1, %s2089_s18  ;;  %s2258_s0 = smov [#allocation12]  }
 0x3d1   : > { %s2093_s9 = sshll.u32 %s2258_s0, 4  ;;  %s2094_s9 = int_to_ptr.vmem [resolvable:$false] %s2093_s9 }
 0x3d2   : > { %p2091_p11 = pnand %p2090_p10, %p3090_p8  ;;  %s2095_s24 = scalar_lea.vmem %s2094_s9, 4096 }
 0x3d3   : > { %s1403_s19 = sshll.u32 %s3087_s25, 11  ;;  %s3089_s7 = smov %s3088_s13 }
 0x3d4   : > { %s2916_s15 = scalar_lea.hbm %s3088_s13, %s1403_s19  ;;  %p2092_p3 = pneg %p2091_p11 }
 0x3d5   : > { %p2096_p5 = scmp.lt.s32.totalorder %s2919_s1, %s2094_s9  ;;  %p2097_p1 = scmp.lt.s32.totalorder %s2095_s24, %s2089_s18 }
 0x3d7   : > { %p2098_p4 = por %p2097_p1, %p2096_p5 }
 0x3d9   : > { %p2099_p2 = pnand %p2098_p4, %p2092_p3 }
 0x3db   : > { %2102 = shalt.err (!%p2099_p2)
}
 0x3dc   : > { %s2103_s28 = scalar_lea.hbm %s2916_s15, 2048  ;;  %s2107_s4 = scalar_lea.hbm %s3089_s7, 4096 }
 0x3dd   : > { %p2104_p6 = scmp.ne.s32.totalorder %s2916_s15, %s2103_s28  ;;  %p2108_p0 = scmp.lt.u32.totalorder %s2916_s15, %s3089_s7 }
 0x3de   : > { %p2109_p12 = scmp.lt.u32.totalorder %s2107_s4, %s2103_s28  ;;  %p2111_p10 = scmp.lt.u32.totalorder %s2103_s28, %s2916_s15 }
 0x3df   : > { %p2105_p7 = pnand %p2104_p6, %p3090_p8 }
 0x3e0   : > { %p2110_p9 = por %p2109_p12, %p2108_p0 }
 0x3e1   : > { %p2106_p13 = pneg %p2105_p7 }
 0x3e2   : > { %p2112_p11 = por %p2111_p10, %p2110_p9 }
 0x3e4   : > { %p2113_p3 = pnand %p2112_p11, %p2106_p13 }
 0x3e6   : > { %2116 = shalt.err (!%p2113_p3)
}
 0x3e7   : > { %s2259_s23 = smov 128   ;;  %s2260_s6 = smov 8  }
 0x3e8   : > { %1794 = dma.vmem_to_hbm [thread:$0]  (%p3090_p8), %s2919_s1, 2048, %s2916_s15, %s2923_s3, %s2259_s23, %s2259_s23, %s2260_s6  }
 0x3e9 PF: > { %p1822_p5 = scmp.ge.s32.totalorder %s2247_s22, 2  ;;  %s1233_s13 = sand.u32 1, %s2195_s30  }
 0x3ea   : > { %p3091_p1 = scmp.ne.s32.totalorder %s3071_s27, 0  ;;  %s1234_s18 = scalar_lea.sflag [#allocation5], %s1233_s13 }
 0x3ec   : > { %p1814_p4 = pnand %p1822_p5, %p3091_p1 }
 0x3ee   : > { %2190 = dma.done.wait (!%p1814_p4), %s1234_s18, 2048  }
 0x3ef   : > { %2192 = vsyncadd (!%p1814_p4), %s1234_s18, 4294965248  ;;  %s29_s22 = sadd.s32 1, %s2247_s22   ;;  %s3093_s14 = sld [smem:[#allocation18_spill]] }
 0x3f0   : > { %p2952_p2 = scmp.ge.s32.totalorder %s29_s22, 6   ;;  %s3094_s13 = sld [smem:[#allocation19_spill]] }
 0x3f1   : > { %s3095_s15 = sld [smem:[#allocation24_spill]]  ;;  %s3096_s27 = sld [smem:[#allocation22_spill]] }
 0x3f2   : > { %s3097_s1 = sld [smem:[#allocation23_spill]]  ;;  %s3098_s30 = smov %s2199_s10 }
 0x3f3   : > { %s3099_s10 = smov %s2203_s11  ;;  %s3100_s11 = smov %s2612_s12 }
 0x3f4   : > { %s3106_s18 = smov %s2239_s20  ;;  %s3107_s19 = smov %s2243_s21 }
 0x3f5   : > { %s3101_s12 = smov %s3093_s14  ;;  %28 = sbr.rel (!%p2952_p2) target bundleno = 22 (0x16), region = 141 }
 0x3f7   : > { %s3102_s14 = smov %s3095_s15  ;;  %s3103_s15 = smov %s2223_s16 }
 0x3f8   : > { %s3104_s16 = smov %s2227_s17  ;;  %s3105_s17 = smov %s2545_s26 }
 0x3f9   : > { %s3108_s20 = smov %s3096_s27  ;;  %s3109_s21 = smov %s3097_s1 }
 0x3fc   :  { %1239 = vsyncpa [#allocation4], 1 }
 0x3fd   :  { %1241 = vsyncpa [#allocation4 + $0x1], 1 }
 0x3fe   :  { %1242 = vsyncpa [#allocation7], 1 }
 0x3ff   :  { %1244 = vsyncpa [#allocation7 + $0x1], 1 }
 0x400   :  { %1245 = vsyncpa [#allocation10], 1 }
 0x401   :  { %1246 = vsyncpa [#allocation5], 1 }
 0x402   :  { %1248 = vsyncpa [#allocation5 + $0x1], 1 }

</bundles_post_ra>
